<compile_context>
chip_gen: v6e
topology: v6e:2x2x1
jax: 0.10.0
libtpu: 0.0.40
codegen_flags: <defaults>
</compile_context>

<pallas_src>
import functools

import jax
import jax.numpy as jnp
from jax.experimental import pallas as pl
from jax.experimental.pallas import tpu as pltpu


def pab_kernel(x_ref, w1_ref, b1_ref, w2_ref, b2_ref, o_ref, x2_ref,
               *, tk, hw_valid, hwp, bf16_exp):
    k = pl.program_id(0)
    need_mask = hw_valid != hwp          # static Python bool

    @pl.when(k == 0)
    def _init():
        # Fold the residual: the output block is resident (constant index_map), so
        # start it at x and accumulate x7 partials straight into it.
        o_ref[...] = x_ref[...]
        # conv2: 1x1 conv (C -> C//8, zero-padded rows) + ReLU over full HW.
        # bf16 MXU operands, f32 accumulation, stored once as bf16.
        x2 = jnp.dot(w2_ref[...], x_ref[...].astype(jnp.bfloat16),
                     preferred_element_type=jnp.float32) + b2_ref[...]
        x2_ref[...] = jnp.maximum(x2, 0.0).astype(jnp.bfloat16)

    off = pl.multiple_of(k * tk, tk)

    # conv1: 1x1 conv (C -> C) + ReLU on this column tile only (bf16 MXU, f32 acc).
    x_t = x_ref[:, pl.ds(off, tk)].astype(jnp.bfloat16)            # (C, tk)
    x1_t = jnp.dot(w1_ref[...], x_t,
                   preferred_element_type=jnp.float32) + b1_ref[...]
    x1_t = jnp.maximum(x1_t, 0.0)                                  # (C, tk) f32
    if need_mask:
        cols = jax.lax.broadcasted_iota(jnp.int32, x1_t.shape, 1) + off
        x1_t = jnp.where(cols < hw_valid, x1_t, 0.0)

    # Gram slab: a[i, j] = sum_c x2[c, off + i] * x2[c, j]  -> (tk, hwp)
    x2_t = x2_ref[:, pl.ds(off, tk)]                               # (C8p, tk)  bf16
    x2_all = x2_ref[...]                                           # (C8p, hwp) bf16
    a = jax.lax.dot_general(x2_t, x2_all, (((0,), (0,)), ((), ())),
                            preferred_element_type=jnp.float32)
    if need_mask:
        jcols = jax.lax.broadcasted_iota(jnp.int32, a.shape, 1)
        a = jnp.where(jcols < hw_valid, a, -jnp.inf)

    # Row-complete softmax for this slab.  The 1/sum normalization is applied to e's
    # rows ((tk,1) broadcast along lanes -> plain VPU mul, hidden under MXU/EUP work)
    # rather than to x1's columns, which would need a cross-lane relayout per step.
    m = jnp.max(a, axis=-1, keepdims=True)                         # (tk, 1)
    if bf16_exp:
        e = jnp.exp((a - m).astype(jnp.bfloat16))                  # bf16 EUP (v6e/v7x)
        l = jnp.sum(e, axis=-1, keepdims=True, dtype=jnp.float32)  # f32 accumulation
        inv_l = pl.reciprocal(l, approx=True)                      # EUP, nearly free
        e_n = e * inv_l.astype(jnp.bfloat16)                       # (tk, hwp) bf16
    else:
        e = jnp.exp(a - m)                                         # f32 EUP (v5e etc.)
        l = jnp.sum(e, axis=-1, keepdims=True)
        inv_l = pl.reciprocal(l, approx=True)
        e_n = (e * inv_l).astype(jnp.bfloat16)

    # x7 partial: (C, tk) @ (tk, hwp), bf16 operands / f32 accumulation, accumulated
    # into the resident output block (already holds the residual x).
    o_ref[...] += jnp.dot(x1_t.astype(jnp.bfloat16), e_n,
                          preferred_element_type=jnp.float32)


def pab_forward(x, w1, b1, w2, b2, *, tk=None, bf16_exp=None):
    """x: (1, C, H, W) f32; w1: (C, C); b1: (C, 1); w2: (C//8, C); b2: (C//8, 1)."""
    n, C, H, W = x.shape
    assert n == 1, "PAB's reshape(C, H*W) only makes sense for batch == 1"
    assert H == W, "PAB's final broadcast (C, W, H) + (1, C, H, W) requires H == W"
    assert C % 8 == 0
    HW = H * W
    C8 = w2.shape[0]
    C8p = ((max(C8, 1) + 15) // 16) * 16       # sublane-pad reduced channels (bf16 tile)

    # Per-generation defaults: 256-deep MXU + bf16 EUP on v6e/v7x; 128 / f32 on v5e.
    kind = ""
    try:
        kind = jax.devices()[0].device_kind.lower()
    except Exception:
        pass
    newer = ("v6" in kind) or ("v7" in kind)
    if bf16_exp is None:
        bf16_exp = newer
    if tk is None:
        tk = 256 if newer else 128
        if "v7" in kind:
            # v7x has 64 MiB VMEM: fall back to tk=128 if the per-step (tk, HWp)
            # slab temporaries would push the resident set past ~48 MiB.
            hwp_try = ((HW + tk - 1) // tk) * tk
            resident_try = 2 * C * hwp_try * 4 + C8p * hwp_try * 2
            if resident_try + tk * hwp_try * 6 > (48 << 20):
                tk = 128
    assert tk % 128 == 0

    HWp = ((HW + tk - 1) // tk) * tk           # lane-dense, multiple of tk
    n_k = HWp // tk

    x_flat = x.reshape(C, HW).astype(jnp.float32)
    if HWp != HW:
        x_flat = jnp.pad(x_flat, ((0, 0), (0, HWp - HW)))
    w1b = w1.astype(jnp.bfloat16)
    b1f = b1.astype(jnp.float32).reshape(C, 1)
    w2p = jnp.pad(w2.astype(jnp.float32), ((0, C8p - C8), (0, 0))).astype(jnp.bfloat16)
    b2p = jnp.pad(b2.astype(jnp.float32).reshape(C8, 1), ((0, C8p - C8), (0, 0)))

    kernel = functools.partial(pab_kernel, tk=tk, hw_valid=HW, hwp=HWp,
                               bf16_exp=bf16_exp)

    # VMEM budget: resident blocks + per-step slab temporaries + margin.
    resident_bytes = (
        C * HWp * 4                    # x (single-buffered resident input)
        + 2 * C * HWp * 4              # output block (default buffering)
        + C8p * HWp * 2                # x2 scratch (bf16)
        + C * C * 2 + C8p * C * 2      # bf16 weights
        + (C + C8p) * 128 * 4          # lane-padded biases
    )
    step_bytes = tk * HWp * (4 + 2 + 2)    # a (f32) + e / e_n (bf16)
    vmem_limit = int(min(128 << 20,
                         max(32 << 20, resident_bytes + 2 * step_bytes + (4 << 20))))

    def _run(single_buffer):
        def const_spec(shape):
            if single_buffer:
                # Fetched exactly once (constant index_map): no need to double-buffer.
                return pl.BlockSpec(shape, lambda k: (0, 0),
                                    pipeline_mode=pl.Buffered(1))
            return pl.BlockSpec(shape, lambda k: (0, 0))

        return pl.pallas_call(
            kernel,
            out_shape=jax.ShapeDtypeStruct((C, HWp), jnp.float32),
            grid_spec=pltpu.PrefetchScalarGridSpec(
                num_scalar_prefetch=0,
                grid=(n_k,),
                in_specs=[
                    const_spec((C, HWp)),      # x (resident, fetched once)
                    const_spec((C, C)),        # w1 (bf16)
                    const_spec((C, 1)),        # b1 (f32)
                    const_spec((C8p, C)),      # w2 (bf16, sublane-padded)
                    const_spec((C8p, 1)),      # b2 (f32, sublane-padded)
                ],
                out_specs=pl.BlockSpec((C, HWp), lambda k: (0, 0)),
                scratch_shapes=[
                    pltpu.VMEM((C8p, HWp), jnp.bfloat16),   # x2 (computed at k == 0)
                ],
            ),
            compiler_params=pltpu.CompilerParams(
                dimension_semantics=("arbitrary",),          # k is a reduction axis
                vmem_limit_bytes=vmem_limit),
            input_output_aliases={0: 0},                     # reuse x_flat's HBM buffer
        )(x_flat, w1b, b1f, w2p, b2p)

    try:
        out_flat = _run(single_buffer=True)
    except Exception:
        # Fallback for Pallas versions that reject pipeline_mode=pl.Buffered(1):
        # identical kernel with default (double) buffering of the constant blocks.
        out_flat = _run(single_buffer=False)

    if HWp != HW:
        out_flat = out_flat[:, :HW]
    # x8 = x7.reshape(C, W, H); with H == W this is numerically identical to
    # reshape(C, H, W), and the residual broadcast yields shape (1, C, H, W).
    return out_flat.reshape(1, C, H, W)


def pab_reference(x, w1, b1, w2, b2):
    """Pure-JAX f32 reference mirroring the PyTorch forward."""
    _, C, H, W = x.shape
    xf = x.reshape(C, H * W)
    x1 = jnp.maximum(w1 @ xf + b1, 0.0)
    x2 = jnp.maximum(w2 @ xf + b2, 0.0)
    a = x2.T @ x2
    s = jax.nn.softmax(a, axis=-1)
    x7 = x1 @ s
    return x7.reshape(1, C, H, W) + x


if __name__ == "__main__":
    C, H, W = 32, 16, 16            # C divisible by 8, square spatial, HW = 256
    key = jax.random.PRNGKey(0)
    kx, k1, k2, k3, k4 = jax.random.split(key, 5)

    x = jax.random.normal(kx, (1, C, H, W), dtype=jnp.float32)

    # 1x1 conv weights as (C_out, C_in), biases as (C_out, 1) broadcasting over HW.
    w1 = 0.1 * jax.random.normal(k1, (C, C), dtype=jnp.float32)
    b1 = 0.1 * jax.random.normal(k2, (C, 1), dtype=jnp.float32)
    w2 = 0.1 * jax.random.normal(k3, (C // 8, C), dtype=jnp.float32)
    b2 = 0.1 * jax.random.normal(k4, (C // 8, 1), dtype=jnp.float32)

    out = pab_forward(x, w1, b1, w2, b2)
    jax.block_until_ready(out)

    ref = pab_reference(x, w1, b1, w2, b2)
    assert out.shape == (1, C, H, W)
    # Tolerance absorbs bf16 MXU operands / bf16 exp (f32 accumulation throughout).
    assert jnp.allclose(out, ref, rtol=2e-2, atol=2e-2), "mismatch vs reference"

    print("KERNEL_OK")
</pallas_src>

<mosaic_0001>
module attributes {stable_mosaic.version = 11 : i64} {
  func.func @pab_kernel(%arg0: i32, %arg1: memref<32x256xf32, #tpu.memory_space<vmem>>, %arg2: memref<32x32xbf16, #tpu.memory_space<vmem>>, %arg3: memref<32x1xf32, #tpu.memory_space<vmem>>, %arg4: memref<16x32xbf16, #tpu.memory_space<vmem>>, %arg5: memref<16x1xf32, #tpu.memory_space<vmem>>, %arg6: memref<32x256xf32, #tpu.memory_space<vmem>>, %arg7: memref<16x256xbf16, #tpu.memory_space<vmem>>) attributes {dimension_semantics = [#tpu.dimension_semantics<arbitrary>], iteration_bounds = array<i64: 2>, scalar_prefetch = 0 : i64, scratch_operands = 1 : i64, tpu.core_type = #tpu.core_type<tc>, window_params = [{pipeline_mode = #tpu.pipeline_mode<synchronous>, transform_indices = @transform_0, window_bounds = array<i64: 32, 256>}, {pipeline_mode = #tpu.pipeline_mode<synchronous>, transform_indices = @transform_1, window_bounds = array<i64: 32, 32>}, {pipeline_mode = #tpu.pipeline_mode<synchronous>, transform_indices = @transform_2, window_bounds = array<i64: 32, 1>}, {pipeline_mode = #tpu.pipeline_mode<synchronous>, transform_indices = @transform_3, window_bounds = array<i64: 16, 32>}, {pipeline_mode = #tpu.pipeline_mode<synchronous>, transform_indices = @transform_4, window_bounds = array<i64: 16, 1>}, {pipeline_mode = #tpu.pipeline_mode<synchronous>, transform_indices = @transform_5, window_bounds = array<i64: 32, 256>}]} {
    %c0_i32 = arith.constant 0 : i32
    %0 = arith.cmpi eq, %arg0, %c0_i32 : i32
    %1 = arith.extui %0 : i1 to i32
    %c0_i32_0 = arith.constant 0 : i32
    %2 = arith.cmpi ne, %1, %c0_i32_0 : i32
    scf.if %2 {
      %c0_17 = arith.constant 0 : index
      %c0_18 = arith.constant 0 : index
      %35 = vector.load %arg1[%c0_17, %c0_18] : memref<32x256xf32, #tpu.memory_space<vmem>>, vector<32x256xf32>
      %c0_19 = arith.constant 0 : index
      %c0_20 = arith.constant 0 : index
      %36 = vector.load %arg6[%c0_19, %c0_20] : memref<32x256xf32, #tpu.memory_space<vmem>>, vector<32x256xf32>
      tpu.vector_store %arg6[%c0_19, %c0_20], %35 {strides = array<i32>} : memref<32x256xf32, #tpu.memory_space<vmem>>, vector<32x256xf32>,
      %c0_21 = arith.constant 0 : index
      %c0_22 = arith.constant 0 : index
      %37 = vector.load %arg4[%c0_21, %c0_22] : memref<16x32xbf16, #tpu.memory_space<vmem>>, vector<16x32xbf16>
      %c0_23 = arith.constant 0 : index
      %c0_24 = arith.constant 0 : index
      %38 = vector.load %arg1[%c0_23, %c0_24] : memref<32x256xf32, #tpu.memory_space<vmem>>, vector<32x256xf32>
      %39 = arith.truncf %38 : vector<32x256xf32> to vector<32x256xbf16>
      %cst_25 = arith.constant dense<0.000000e+00> : vector<16x256xf32>
      %40 = tpu.matmul %37, %39, %cst_25 {dimension_numbers = #tpu.dot_dimension_numbers<[1], [0], [0], [1], [0, 0, 1, 1], [], []>} : vector<16x32xbf16>, vector<32x256xbf16>, vector<16x256xf32> -> vector<16x256xf32>
      %c0_26 = arith.constant 0 : index
      %c0_27 = arith.constant 0 : index
      %41 = vector.load %arg5[%c0_26, %c0_27] : memref<16x1xf32, #tpu.memory_space<vmem>>, vector<16x1xf32>
      %42 = vector.broadcast %41 : vector<16x1xf32> to vector<16x256xf32>
      %43 = arith.addf %40, %42 : vector<16x256xf32>
      %cst_28 = arith.constant 0.000000e+00 : f32
      %44 = vector.broadcast %cst_28 : f32 to vector<16x256xf32>
      %45 = arith.maximumf %43, %44 : vector<16x256xf32>
      %46 = arith.truncf %45 : vector<16x256xf32> to vector<16x256xbf16>
      %c0_29 = arith.constant 0 : index
      %c0_30 = arith.constant 0 : index
      %47 = vector.load %arg7[%c0_29, %c0_30] : memref<16x256xbf16, #tpu.memory_space<vmem>>, vector<16x256xbf16>
      tpu.vector_store %arg7[%c0_29, %c0_30], %46 {strides = array<i32>} : memref<16x256xbf16, #tpu.memory_space<vmem>>, vector<16x256xbf16>,
    } else {
    }
    %c128_i32 = arith.constant 128 : i32
    %3 = arith.muli %arg0, %c128_i32 : i32
    %4 = tpu.assume_multiple %3, 128 : i32
    %c0 = arith.constant 0 : index
    %5 = arith.index_cast %4 : i32 to index
    %6 = vector.load %arg1[%c0, %5] : memref<32x256xf32, #tpu.memory_space<vmem>>, vector<32x128xf32>
    %7 = arith.truncf %6 : vector<32x128xf32> to vector<32x128xbf16>
    %c0_1 = arith.constant 0 : index
    %c0_2 = arith.constant 0 : index
    %8 = vector.load %arg2[%c0_1, %c0_2] : memref<32x32xbf16, #tpu.memory_space<vmem>>, vector<32x32xbf16>
    %cst = arith.constant dense<0.000000e+00> : vector<32x128xf32>
    %9 = tpu.matmul %8, %7, %cst {dimension_numbers = #tpu.dot_dimension_numbers<[1], [0], [0], [1], [0, 0, 1, 1], [], []>} : vector<32x32xbf16>, vector<32x128xbf16>, vector<32x128xf32> -> vector<32x128xf32>
    %c0_3 = arith.constant 0 : index
    %c0_4 = arith.constant 0 : index
    %10 = vector.load %arg3[%c0_3, %c0_4] : memref<32x1xf32, #tpu.memory_space<vmem>>, vector<32x1xf32>
    %11 = vector.broadcast %10 : vector<32x1xf32> to vector<32x128xf32>
    %12 = arith.addf %9, %11 : vector<32x128xf32>
    %cst_5 = arith.constant 0.000000e+00 : f32
    %13 = vector.broadcast %cst_5 : f32 to vector<32x128xf32>
    %14 = arith.maximumf %12, %13 : vector<32x128xf32>
    %c0_6 = arith.constant 0 : index
    %15 = arith.index_cast %4 : i32 to index
    %16 = vector.load %arg7[%c0_6, %15] : memref<16x256xbf16, #tpu.memory_space<vmem>>, vector<16x128xbf16>
    %c0_7 = arith.constant 0 : index
    %c0_8 = arith.constant 0 : index
    %17 = vector.load %arg7[%c0_7, %c0_8] : memref<16x256xbf16, #tpu.memory_space<vmem>>, vector<16x256xbf16>
    %cst_9 = arith.constant dense<0.000000e+00> : vector<128x256xf32>
    %18 = tpu.matmul %16, %17, %cst_9 {dimension_numbers = #tpu.dot_dimension_numbers<[0], [0], [1], [1], [0, 1, 1, 1], [], []>} : vector<16x128xbf16>, vector<16x256xbf16>, vector<128x256xf32> -> vector<128x256xf32>
    %cst_10 = arith.constant dense<0xFF800000> : vector<128xf32>
    %19 = vector.multi_reduction <maximumf>, %18, %cst_10 [1] : vector<128x256xf32> to vector<128xf32>
    %20 = vector.shape_cast %19 : vector<128xf32> to vector<128x1xf32>
    %21 = vector.broadcast %20 : vector<128x1xf32> to vector<128x256xf32>
    %22 = arith.subf %18, %21 : vector<128x256xf32>
    %23 = math.exp %22 : vector<128x256xf32>
    %cst_11 = arith.constant dense<0.000000e+00> : vector<128xf32>
    %24 = vector.multi_reduction <add>, %23, %cst_11 [1] : vector<128x256xf32> to vector<128xf32>
    %25 = vector.shape_cast %24 : vector<128xf32> to vector<128x1xf32>
    %26 = tpu.reciprocal %25 {approx = true} : vector<128x1xf32> -> vector<128x1xf32>
    %27 = vector.broadcast %26 : vector<128x1xf32> to vector<128x256xf32>
    %28 = arith.mulf %23, %27 : vector<128x256xf32>
    %29 = arith.truncf %28 : vector<128x256xf32> to vector<128x256xbf16>
    %c0_12 = arith.constant 0 : index
    %c0_13 = arith.constant 0 : index
    %30 = vector.load %arg6[%c0_12, %c0_13] : memref<32x256xf32, #tpu.memory_space<vmem>>, vector<32x256xf32>
    %31 = arith.truncf %14 : vector<32x128xf32> to vector<32x128xbf16>
    %cst_14 = arith.constant dense<0.000000e+00> : vector<32x256xf32>
    %32 = tpu.matmul %31, %29, %cst_14 {dimension_numbers = #tpu.dot_dimension_numbers<[1], [0], [0], [1], [0, 0, 1, 1], [], []>} : vector<32x128xbf16>, vector<128x256xbf16>, vector<32x256xf32> -> vector<32x256xf32>
    %33 = arith.addf %30, %32 : vector<32x256xf32>
    %c0_15 = arith.constant 0 : index
    %c0_16 = arith.constant 0 : index
    %34 = vector.load %arg6[%c0_15, %c0_16] : memref<32x256xf32, #tpu.memory_space<vmem>>, vector<32x256xf32>
    tpu.vector_store %arg6[%c0_15, %c0_16], %33 {strides = array<i32>} : memref<32x256xf32, #tpu.memory_space<vmem>>, vector<32x256xf32>,
    return
  }
  func.func @transform_0(%arg0: i32) -> (i32, i32) {
    %c0_i32 = arith.constant 0 : i32
    %c0_i32_0 = arith.constant 0 : i32
    %c0_i32_1 = arith.constant 0 : i32
    return %c0_i32, %c0_i32_0 : i32, i32
  }
  func.func @transform_1(%arg0: i32) -> (i32, i32) {
    %c0_i32 = arith.constant 0 : i32
    %c0_i32_0 = arith.constant 0 : i32
    %c0_i32_1 = arith.constant 0 : i32
    return %c0_i32, %c0_i32_0 : i32, i32
  }
  func.func @transform_2(%arg0: i32) -> (i32, i32) {
    %c0_i32 = arith.constant 0 : i32
    %c0_i32_0 = arith.constant 0 : i32
    %c0_i32_1 = arith.constant 0 : i32
    return %c0_i32, %c0_i32_0 : i32, i32
  }
  func.func @transform_3(%arg0: i32) -> (i32, i32) {
    %c0_i32 = arith.constant 0 : i32
    %c0_i32_0 = arith.constant 0 : i32
    %c0_i32_1 = arith.constant 0 : i32
    return %c0_i32, %c0_i32_0 : i32, i32
  }
  func.func @transform_4(%arg0: i32) -> (i32, i32) {
    %c0_i32 = arith.constant 0 : i32
    %c0_i32_0 = arith.constant 0 : i32
    %c0_i32_1 = arith.constant 0 : i32
    return %c0_i32, %c0_i32_0 : i32, i32
  }
  func.func @transform_5(%arg0: i32) -> (i32, i32) {
    %c0_i32 = arith.constant 0 : i32
    %c0_i32_0 = arith.constant 0 : i32
    %c0_i32_1 = arith.constant 0 : i32
    return %c0_i32, %c0_i32_0 : i32, i32
  }
}

module attributes {stable_mosaic.version = 11 : i64} {
  func.func @pab_kernel(%arg0: i32, %arg1: memref<32x256xf32, #tpu.memory_space<vmem>>, %arg2: memref<32x32xbf16, #tpu.memory_space<vmem>>, %arg3: memref<32x1xf32, #tpu.memory_space<vmem>>, %arg4: memref<16x32xbf16, #tpu.memory_space<vmem>>, %arg5: memref<16x1xf32, #tpu.memory_space<vmem>>, %arg6: memref<32x256xf32, #tpu.memory_space<vmem>>, %arg7: memref<16x256xbf16, #tpu.memory_space<vmem>>) attributes {dimension_semantics = [#tpu.dimension_semantics<arbitrary>], iteration_bounds = array<i64: 2>, scalar_prefetch = 0 : i64, scratch_operands = 1 : i64, tpu.core_type = #tpu.core_type<tc>, window_params = [{pipeline_mode = #tpu.pipeline_mode<synchronous>, transform_indices = @transform_0, window_bounds = array<i64: 32, 256>}, {pipeline_mode = #tpu.pipeline_mode<synchronous>, transform_indices = @transform_1, window_bounds = array<i64: 32, 32>}, {pipeline_mode = #tpu.pipeline_mode<synchronous>, transform_indices = @transform_2, window_bounds = array<i64: 32, 1>}, {pipeline_mode = #tpu.pipeline_mode<synchronous>, transform_indices = @transform_3, window_bounds = array<i64: 16, 32>}, {pipeline_mode = #tpu.pipeline_mode<synchronous>, transform_indices = @transform_4, window_bounds = array<i64: 16, 1>}, {pipeline_mode = #tpu.pipeline_mode<synchronous>, transform_indices = @transform_5, window_bounds = array<i64: 32, 256>}]} {
    %c0_i32 = arith.constant 0 : i32
    %0 = arith.cmpi eq, %arg0, %c0_i32 : i32
    %1 = arith.extui %0 : i1 to i32
    %c0_i32_0 = arith.constant 0 : i32
    %2 = arith.cmpi ne, %1, %c0_i32_0 : i32
    scf.if %2 {
      %c0_17 = arith.constant 0 : index
      %c0_18 = arith.constant 0 : index
      %35 = vector.load %arg1[%c0_17, %c0_18] : memref<32x256xf32, #tpu.memory_space<vmem>>, vector<32x256xf32>
      %c0_19 = arith.constant 0 : index
      %c0_20 = arith.constant 0 : index
      %36 = vector.load %arg6[%c0_19, %c0_20] : memref<32x256xf32, #tpu.memory_space<vmem>>, vector<32x256xf32>
      tpu.vector_store %arg6[%c0_19, %c0_20], %35 {strides = array<i32>} : memref<32x256xf32, #tpu.memory_space<vmem>>, vector<32x256xf32>,
      %c0_21 = arith.constant 0 : index
      %c0_22 = arith.constant 0 : index
      %37 = vector.load %arg4[%c0_21, %c0_22] : memref<16x32xbf16, #tpu.memory_space<vmem>>, vector<16x32xbf16>
      %c0_23 = arith.constant 0 : index
      %c0_24 = arith.constant 0 : index
      %38 = vector.load %arg1[%c0_23, %c0_24] : memref<32x256xf32, #tpu.memory_space<vmem>>, vector<32x256xf32>
      %39 = arith.truncf %38 : vector<32x256xf32> to vector<32x256xbf16>
      %cst_25 = arith.constant dense<0.000000e+00> : vector<16x256xf32>
      %40 = tpu.matmul %37, %39, %cst_25 {dimension_numbers = #tpu.dot_dimension_numbers<[1], [0], [0], [1], [0, 0, 1, 1], [], []>} : vector<16x32xbf16>, vector<32x256xbf16>, vector<16x256xf32> -> vector<16x256xf32>
      %c0_26 = arith.constant 0 : index
      %c0_27 = arith.constant 0 : index
      %41 = vector.load %arg5[%c0_26, %c0_27] : memref<16x1xf32, #tpu.memory_space<vmem>>, vector<16x1xf32>
      %42 = vector.broadcast %41 : vector<16x1xf32> to vector<16x256xf32>
      %43 = arith.addf %40, %42 : vector<16x256xf32>
      %cst_28 = arith.constant 0.000000e+00 : f32
      %44 = vector.broadcast %cst_28 : f32 to vector<16x256xf32>
      %45 = arith.maximumf %43, %44 : vector<16x256xf32>
      %46 = arith.truncf %45 : vector<16x256xf32> to vector<16x256xbf16>
      %c0_29 = arith.constant 0 : index
      %c0_30 = arith.constant 0 : index
      %47 = vector.load %arg7[%c0_29, %c0_30] : memref<16x256xbf16, #tpu.memory_space<vmem>>, vector<16x256xbf16>
      tpu.vector_store %arg7[%c0_29, %c0_30], %46 {strides = array<i32>} : memref<16x256xbf16, #tpu.memory_space<vmem>>, vector<16x256xbf16>,
    } else {
    }
    %c128_i32 = arith.constant 128 : i32
    %3 = arith.muli %arg0, %c128_i32 : i32
    %4 = tpu.assume_multiple %3, 128 : i32
    %c0 = arith.constant 0 : index
    %5 = arith.index_cast %4 : i32 to index
    %6 = vector.load %arg1[%c0, %5] : memref<32x256xf32, #tpu.memory_space<vmem>>, vector<32x128xf32>
    %7 = arith.truncf %6 : vector<32x128xf32> to vector<32x128xbf16>
    %c0_1 = arith.constant 0 : index
    %c0_2 = arith.constant 0 : index
    %8 = vector.load %arg2[%c0_1, %c0_2] : memref<32x32xbf16, #tpu.memory_space<vmem>>, vector<32x32xbf16>
    %cst = arith.constant dense<0.000000e+00> : vector<32x128xf32>
    %9 = tpu.matmul %8, %7, %cst {dimension_numbers = #tpu.dot_dimension_numbers<[1], [0], [0], [1], [0, 0, 1, 1], [], []>} : vector<32x32xbf16>, vector<32x128xbf16>, vector<32x128xf32> -> vector<32x128xf32>
    %c0_3 = arith.constant 0 : index
    %c0_4 = arith.constant 0 : index
    %10 = vector.load %arg3[%c0_3, %c0_4] : memref<32x1xf32, #tpu.memory_space<vmem>>, vector<32x1xf32>
    %11 = vector.broadcast %10 : vector<32x1xf32> to vector<32x128xf32>
    %12 = arith.addf %9, %11 : vector<32x128xf32>
    %cst_5 = arith.constant 0.000000e+00 : f32
    %13 = vector.broadcast %cst_5 : f32 to vector<32x128xf32>
    %14 = arith.maximumf %12, %13 : vector<32x128xf32>
    %c0_6 = arith.constant 0 : index
    %15 = arith.index_cast %4 : i32 to index
    %16 = vector.load %arg7[%c0_6, %15] : memref<16x256xbf16, #tpu.memory_space<vmem>>, vector<16x128xbf16>
    %c0_7 = arith.constant 0 : index
    %c0_8 = arith.constant 0 : index
    %17 = vector.load %arg7[%c0_7, %c0_8] : memref<16x256xbf16, #tpu.memory_space<vmem>>, vector<16x256xbf16>
    %cst_9 = arith.constant dense<0.000000e+00> : vector<128x256xf32>
    %18 = tpu.matmul %16, %17, %cst_9 {dimension_numbers = #tpu.dot_dimension_numbers<[0], [0], [1], [1], [0, 1, 1, 1], [], []>} : vector<16x128xbf16>, vector<16x256xbf16>, vector<128x256xf32> -> vector<128x256xf32>
    %cst_10 = arith.constant dense<0xFF800000> : vector<128xf32>
    %19 = vector.multi_reduction <maximumf>, %18, %cst_10 [1] : vector<128x256xf32> to vector<128xf32>
    %20 = vector.shape_cast %19 : vector<128xf32> to vector<128x1xf32>
    %21 = vector.broadcast %20 : vector<128x1xf32> to vector<128x256xf32>
    %22 = arith.subf %18, %21 : vector<128x256xf32>
    %23 = math.exp %22 : vector<128x256xf32>
    %cst_11 = arith.constant dense<0.000000e+00> : vector<128xf32>
    %24 = vector.multi_reduction <add>, %23, %cst_11 [1] : vector<128x256xf32> to vector<128xf32>
    %25 = vector.shape_cast %24 : vector<128xf32> to vector<128x1xf32>
    %26 = tpu.reciprocal %25 {approx = true} : vector<128x1xf32> -> vector<128x1xf32>
    %27 = vector.broadcast %26 : vector<128x1xf32> to vector<128x256xf32>
    %28 = arith.mulf %23, %27 : vector<128x256xf32>
    %29 = arith.truncf %28 : vector<128x256xf32> to vector<128x256xbf16>
    %c0_12 = arith.constant 0 : index
    %c0_13 = arith.constant 0 : index
    %30 = vector.load %arg6[%c0_12, %c0_13] : memref<32x256xf32, #tpu.memory_space<vmem>>, vector<32x256xf32>
    %31 = arith.truncf %14 : vector<32x128xf32> to vector<32x128xbf16>
    %cst_14 = arith.constant dense<0.000000e+00> : vector<32x256xf32>
    %32 = tpu.matmul %31, %29, %cst_14 {dimension_numbers = #tpu.dot_dimension_numbers<[1], [0], [0], [1], [0, 0, 1, 1], [], []>} : vector<32x128xbf16>, vector<128x256xbf16>, vector<32x256xf32> -> vector<32x256xf32>
    %33 = arith.addf %30, %32 : vector<32x256xf32>
    %c0_15 = arith.constant 0 : index
    %c0_16 = arith.constant 0 : index
    %34 = vector.load %arg6[%c0_15, %c0_16] : memref<32x256xf32, #tpu.memory_space<vmem>>, vector<32x256xf32>
    tpu.vector_store %arg6[%c0_15, %c0_16], %33 {strides = array<i32>} : memref<32x256xf32, #tpu.memory_space<vmem>>, vector<32x256xf32>,
    return
  }
  func.func @transform_0(%arg0: i32) -> (i32, i32) {
    %c0_i32 = arith.constant 0 : i32
    %c0_i32_0 = arith.constant 0 : i32
    %c0_i32_1 = arith.constant 0 : i32
    return %c0_i32, %c0_i32_0 : i32, i32
  }
  func.func @transform_1(%arg0: i32) -> (i32, i32) {
    %c0_i32 = arith.constant 0 : i32
    %c0_i32_0 = arith.constant 0 : i32
    %c0_i32_1 = arith.constant 0 : i32
    return %c0_i32, %c0_i32_0 : i32, i32
  }
  func.func @transform_2(%arg0: i32) -> (i32, i32) {
    %c0_i32 = arith.constant 0 : i32
    %c0_i32_0 = arith.constant 0 : i32
    %c0_i32_1 = arith.constant 0 : i32
    return %c0_i32, %c0_i32_0 : i32, i32
  }
  func.func @transform_3(%arg0: i32) -> (i32, i32) {
    %c0_i32 = arith.constant 0 : i32
    %c0_i32_0 = arith.constant 0 : i32
    %c0_i32_1 = arith.constant 0 : i32
    return %c0_i32, %c0_i32_0 : i32, i32
  }
  func.func @transform_4(%arg0: i32) -> (i32, i32) {
    %c0_i32 = arith.constant 0 : i32
    %c0_i32_0 = arith.constant 0 : i32
    %c0_i32_1 = arith.constant 0 : i32
    return %c0_i32, %c0_i32_0 : i32, i32
  }
  func.func @transform_5(%arg0: i32) -> (i32, i32) {
    %c0_i32 = arith.constant 0 : i32
    %c0_i32_0 = arith.constant 0 : i32
    %c0_i32_1 = arith.constant 0 : i32
    return %c0_i32, %c0_i32_0 : i32, i32
  }
}

</mosaic_0001>

<bundles_post_ra>
// kernel: tpu_custom_call.1
= control target key start
LH: loop header
LB: loop body
LE: loop exit
PB: predicated region body
PF: predicated region fallthrough
CT: control target
= control target key end

     0   :  { %10 = vsyncpa [#allocation4], 0  ;;  %s1637_s0 = inlined_call_operand.hbm [shape: f32[32,256], index: 0, kind: input, shape index: {}, may-alias: {0,5}]   ;;  %s1638_s1 = inlined_call_operand.vmem [shape: bf16[32,32], index: 1, kind: input, shape index: {}]   ;;  %s1639_s2 = inlined_call_operand.vmem [shape: f32[32,1], index: 2, kind: input, shape index: {}]   ;;  %s1640_s3 = inlined_call_operand.vmem [shape: bf16[16,32], index: 3, kind: input, shape index: {}]   ;;  %s1641_s4 = inlined_call_operand.vmem [shape: f32[16,1], index: 4, kind: input, shape index: {}]   ;;  %s1642_s5 = inlined_call_operand.hbm [shape: f32[32,256], index: 5, kind: output, shape index: {}, may-alias: {0,5}]  }
   0x1   :  { %11 = vsyncpa [#allocation5], 0  ;;  %s1283_s18 = smov 0  }
   0x2 LB: > { %s1289_s19 = sadd.s32 4294967295, %s1243_s18   ;;  %p996_p0 = scmp.ge.s32.totalorder %s1243_s18, 1  ;;  %s1243_s18 = sphi %s1283_s18, %s17_s18  }
   0x3   : > { %p148_p1 = scmp.lt.s32.totalorder %s1243_s18, 3  ;;  %s1245_s20 = smov [#allocation3]  }
   0x4   : > { %s160_s21 = sshll.u32 %s1245_s20, 4  ;;  %p1053_p4 = scmp.eq.s32.totalorder %s1289_s19, 0  ;;  %s161_s21 = int_to_ptr.vmem [resolvable:$true] %s160_s21 }
   0x5   : > { %p1294_p3 = pnand %p996_p0, %p148_p1  ;;  %s1190_s23 = scalar_lea.vmem %s161_s21, 1024 }
   0x6   : > { %p1191_p8 = scmp.ne.s32.totalorder %s161_s21, %s1190_s23  ;;  %p1198_p11 = scmp.lt.s32.totalorder %s161_s21, %s161_s21 }
   0x7   : > { %p1049_p5 = pneg %p1294_p3  ;;  %p1199_p12 = scmp.lt.s32.totalorder %s1190_s23, %s1190_s23 }
   0x9   : > { %p1050_p6 = pnand %p1053_p4, %p1049_p5  ;;  %p1200_p13 = por %p1199_p12, %p1198_p11 }
   0xb   : > { %p1181_p7 = pneg %p1050_p6 }
   0xd   : > { %p1193_p9 = pnand %p1191_p8, %p1181_p7 }
   0xf   : > { %p1194_p10 = pneg %p1193_p9 }
  0x11   : > { %p1201_p2 = pnand %p1200_p13, %p1194_p10 }
  0x13   : > { %1204 = shalt.err (!%p1201_p2)
}
  0x14   : > { %s1246_s24 = smov 256   ;;  %s1247_s25 = smov 16  }
  0x15   : > { %1052 = dma.hbm_to_vmem [thread:$0]  (!%p1050_p6), %s1637_s0, 1024, %s161_s21, [#allocation4], %s1246_s24, %s1246_s24, %s1247_s25  }
  0x16   : > { %188 = sbr.rel (%p1294_p3) target bundleno = 1196 (0x4ac), region = 40 }
  0x1b   : > { %1234 = dma.done.wait (%p1053_p4), [#allocation4], 1024  }
  0x1c   : > { %1236 = vsyncadd (%p1053_p4), [#allocation4], 4294966272  ;;  %p1644_p0 = scmp.ne.s32.totalorder %s1289_s19, 0 }
  0x1e   : > { %210 = sbr.rel (%p1644_p0) target bundleno = 254 (0xfe), region = 48 }
  0x23   : > { %v211_v0 = vld [vmem:[#allocation3] sm:$0xff]  ;;  %v212_v1 = vld [vmem:[#allocation3 + $0x8] sm:$0xff]  ;;  %v213_v2 = vld [vmem:[#allocation3 + $0x10] sm:$0xff]  ;;  %v1248_v6 = vmov 0   ;;  %vm258_vm0 = vcmask 261120  }
  0x24   : > { %v214_v3 = vld [vmem:[#allocation3 + $0x18] sm:$0xff]  ;;  %v215_v4 = vld [vmem:[#allocation3 + $0x20] sm:$0xff]  ;;  %v216_v5 = vld [vmem:[#allocation3 + $0x28] sm:$0xff]  ;;  %219 = vst [vmem:[#allocation6] sm:$0xff] %v211_v0  ;;  %294 = vmatprep.mubr.bf16.mxu0 %v1248_v6  ;;  %1073 = vset.pattern.permute.xlu0 %v1248_v6  ;;  %v237_v14 = vpack.c.bf16 %v213_v2, %v211_v0 }
  0x25   : > { %220 = vst [vmem:[#allocation6 + $0x8] sm:$0xff] %v212_v1  ;;  %221 = vst [vmem:[#allocation6 + $0x10] sm:$0xff] %v213_v2  ;;  %v217_v7 = vld [vmem:[#allocation3 + $0x30] sm:$0xff]  ;;  %v218_v8 = vld [vmem:[#allocation3 + $0x38] sm:$0xff]  ;;  %v238_v11 = vpack.c.bf16 %v214_v3, %v212_v1 }
  0x26   : > { %222 = vst [vmem:[#allocation6 + $0x18] sm:$0xff] %v214_v3  ;;  %223 = vst [vmem:[#allocation6 + $0x20] sm:$0xff] %v215_v4  ;;  %v240_v9 = vpack.c.bf16 %v218_v8, %v216_v5  ;;  %v239_v10 = vpack.c.bf16 %v217_v7, %v215_v4  ;;  %v241_v12 = vld [vmem:[%s1641_s4] sm:$0xff]  ;;  %v242_v13 = vld [vmem:[%s1641_s4 + $0x8] sm:$0xff] }
  0x27   : > { %224 = vst [vmem:[#allocation6 + $0x28] sm:$0xff] %v216_v5  ;;  %225 = vst [vmem:[#allocation6 + $0x30] sm:$0xff] %v217_v7  ;;  %245 = vperm.xlu0 %1073, %v241_v12   ;;  %v1074_v15 = vld [vmem:[%s1640_s3] sm:$0xff]  }
  0x28   : > { %226 = vst [vmem:[#allocation6 + $0x38] sm:$0xff] %v218_v8  ;;  %274 = vmatprep.subr.bf16.mxu0 %v240_v9 }
  0x29   : > { %275 = vmatpush1.bf16.msra.mxu0 %v239_v10 }
  0x2a   : > { %276 = vmatprep.subr.bf16.mxu0 %v238_v11 }
  0x2b   : > { %250 = vperm.xlu0 %1073, %v242_v13  }
  0x2d   : > { %277 = vmatpush1.bf16.msra.mxu0 %v237_v14 }
  0x30   : > { %1002 = vmatmul.mubr.msk.bf16.vlgmr.msra.gmra.mxu0 %vm258_vm0, %v1074_v15 }
  0xa2   : > { %v246_v16 = vpop.permute.xlu0 %245 }
  0xa6   : > { %v251_v21 = vpop.permute.xlu0 %250 }
  0xf0   : > { %v296_v17 = vpop.f32.mrf.mxu0 }
  0xf1   : > { %v297_v18 = vadd.f32 %v296_v17, %v246_v16 }
  0xf2   : > { %v298_v19 = vpop.f32.mrf.mxu0 }
  0xf3   : > { %v299_v20 = vadd.f32 %v298_v19, %v246_v16  ;;  %v305_v23 = vmax.f32 %v297_v18, 0.0 }
  0xf4   : > { %v300_v22 = vpop.f32.mrf.mxu0 }
  0xf5   : > { %v306_v24 = vmax.f32 %v299_v20, 0.0  ;;  %v301_v25 = vadd.f32 %v300_v22, %v251_v21 }
  0xf6   : > { %v302_v26 = vpop.f32.mrf.mxu0 }
  0xf7   : > { %v1027_v27 = vpack.c.bf16 %v306_v24, %v305_v23  ;;  %v303_v28 = vadd.f32 %v302_v26, %v251_v21  ;;  %v307_v29 = vmax.f32 %v301_v25, 0.0 }
  0xf9   : > { %321 = vst [vmem:[#allocation2] sm:$0xff] %v1027_v27  ;;  %v308_v30 = vmax.f32 %v303_v28, 0.0 }
  0xfb   : > { %v1028_v31 = vpack.c.bf16 %v308_v30, %v307_v29 }
  0xfd   : > { %322 = vst [vmem:[#allocation2 + $0x8] sm:$0xff] %v1028_v31 }
  0xfe PF: > { %s1005_s9 = sshll.u32 %s1289_s19, 7  ;;  %v1249_v34 = vmov 0   ;;  %vm470_vm1 = vcmask 130048   ;;  %v1081_v31 = vld [vmem:[%s1638_s1] sm:$0xff]   ;;  %vm372_vm2 = vcmask 261120   ;;  %s1250_s29 = smov [#allocation6]  }
  0xff   : > { %s1324_s10 = sshra.s32 %s1005_s9, 7  ;;  %527 = vmatprep.mubr.bf16.mxu1 %v1249_v34  ;;  %1075 = vset.pattern.permute.xlu1 %v1249_v34  ;;  %s949_s30 = sshll.u32 %s1250_s29, 4  ;;  %s950_s30 = int_to_ptr.vmem [resolvable:$true] %s949_s30 }
 0x100   : > { %s1011_s11 = sshll.u32 %s1324_s10, 2  ;;  %s1006_s13 = sshll.u32 %s1324_s10, 3  ;;  %1037 = vmatprep.mubr.msk.bf16.mxu0 %vm372_vm2, %v1081_v31 }
 0x101   : > { %s433_s12 = scalar_lea.vmem [#allocation2], %s1011_s11  ;;  %s327_s14 = scalar_lea.vmem [#allocation3], %s1006_s13 }
 0x102   : > { %v330_v23 = vld [vmem:[%s327_s14 + $0x20] sm:$0xff]  ;;  %v331_v24 = vld [vmem:[%s327_s14 + $0x30] sm:$0xff]  ;;  %p1055_p1 = scmp.eq.s32.totalorder %s1289_s19, 1  ;;  %s1205_s6 = scalar_lea.vmem %s950_s30, 1024 }
 0x103   : > { %v333_v25 = vpack.c.bf16 %v331_v24, %v330_v23  ;;  %v328_v27 = vld [vmem:[%s327_s14] sm:$0xff]  ;;  %v329_v28 = vld [vmem:[%s327_s14 + $0x10] sm:$0xff]  ;;  %p1206_p2 = scmp.ne.s32.totalorder %s950_s30, %s1205_s6  ;;  %p1212_p5 = scmp.lt.s32.totalorder %s950_s30, %s950_s30 }
 0x104   : > { %v1078_v32 = vld [vmem:[#allocation2 + $0x4] ss:$8 sps:$4 sm:$0xff]   ;;  %v1080_v33 = vld [vmem:[#allocation2] ss:$8 sps:$4 sm:$0xff]   ;;  %v332_v29 = vpack.c.bf16 %v329_v28, %v328_v27  ;;  %p1213_p6 = scmp.lt.s32.totalorder %s1205_s6, %s1205_s6 }
 0x105   : > { %509 = vmatprep.subr.bf16.mxu1 %v1078_v32  ;;  %v1077_v35 = vld [vmem:[%s433_s12] ss:$8 sps:$4 sm:$0xff]   ;;  %1033 = vmatprep.subr.bf16.mxu0 %v333_v25  ;;  %p1207_p3 = pnand %p1206_p2, %p1055_p1 }
 0x106   : > { %510 = vmatpush1.bf16.msra.mxu1 %v1080_v33  ;;  %444 = vxpose.xlu0.c.b16.start.end [1/1] (short) %v1077_v35, 128  ;;  %v1082_v32 = vld [vmem:[%s1638_s1 + $0x8] sm:$0xff]   ;;  %p1214_p7 = por %p1213_p6, %p1212_p5 }
 0x107   : > { %1034 = vmatpush3.bf16.msra.mxu0 %v333_v25  ;;  %p1208_p4 = pneg %p1207_p3 }
 0x108   : > { %1035 = vmatprep.subr.bf16.mxu0 %v332_v29 }
 0x109   : > { %p1215_p8 = pnand %p1214_p7, %p1208_p4 }
 0x10b   : > { %1036 = vmatpush3.bf16.msra.mxu0 %v332_v29 }
 0x10e   : > { %1038 = vmatmul.mubr.msk.bf16.vlgmr.msra.gmra.mxu0 %vm372_vm2, %v1082_v32 }
 0x10f   : > { %1076 = vset.pattern.permute.xlu0 %v1249_v34  ;;  %906 = vmatprep.mubr.bf16.mxu0 %v1249_v34 }
 0x168   : > { %v452_v36 = vpop.trf.xlu0 }
 0x169   : > { %1015 = vmatmul.mubr.msk.bf16.vlgmr.msra.gmra.mxu1 %vm470_vm1, %v452_v36 }
 0x16a   : > { %537 = vmatprep.mubr.bf16.mxu1 %v1249_v34 }
 0x16c   : > { %v453_v37 = vpop.trf.xlu0 }
 0x170   : > { %v454_v38 = vpop.trf.xlu0 }
 0x171   : > { %1016 = vmatmul.mubr.msk.bf16.gmra.mxu1 %vm470_vm1, %v453_v37 }
 0x172   : > { %547 = vmatprep.mubr.bf16.mxu1 %v1249_v34 }
 0x174   : > { %v455_v39 = vpop.trf.xlu0 }
 0x178   : > { %v456_v40 = vpop.trf.xlu0 }
 0x179   : > { %1017 = vmatmul.mubr.msk.bf16.gmra.mxu1 %vm470_vm1, %v454_v38 }
 0x17a   : > { %557 = vmatprep.mubr.bf16.mxu1 %v1249_v34 }
 0x17c   : > { %v457_v41 = vpop.trf.xlu0 }
 0x180   : > { %v458_v42 = vpop.trf.xlu0 }
 0x181   : > { %1018 = vmatmul.mubr.msk.bf16.gmra.mxu1 %vm470_vm1, %v455_v39 }
 0x182   : > { %567 = vmatprep.mubr.bf16.mxu1 %v1249_v34 }
 0x184   : > { %v459_v43 = vpop.trf.xlu0 }
 0x189   : > { %1019 = vmatmul.mubr.msk.bf16.gmra.mxu1 %vm470_vm1, %v456_v40 }
 0x18a   : > { %577 = vmatprep.mubr.bf16.mxu1 %v1249_v34 }
 0x191   : > { %1020 = vmatmul.mubr.msk.bf16.gmra.mxu1 %vm470_vm1, %v457_v41 }
 0x192   : > { %587 = vmatprep.mubr.bf16.mxu1 %v1249_v34 }
 0x199   : > { %1021 = vmatmul.mubr.msk.bf16.gmra.mxu1 %vm470_vm1, %v458_v42 }
 0x19a   : > { %597 = vmatprep.mubr.bf16.mxu1 %v1249_v34 }
 0x1a1   : > { %1022 = vmatmul.mubr.msk.bf16.gmra.mxu1 %vm470_vm1, %v459_v43 }
 0x229   : > { %v1345_v44 = vpop.f32.mrf.mxu1 }
 0x22b   : > { %v1347_v45 = vpop.f32.mrf.mxu1 }
 0x22c   : > { %v608_v36 = vmax.f32 %v1345_v44, %v1347_v45 }
 0x22d   : > { %v1349_v46 = vpop.f32.mrf.mxu1 }
 0x22f   : > { %v1351_v47 = vpop.f32.mrf.mxu1 }
 0x230   : > { %v611_v19 = vmax.f32 %v1349_v46, %v1351_v47 }
 0x231   : > { %v1353_v48 = vpop.f32.mrf.mxu1 }
 0x233   : > { %v1355_v49 = vpop.f32.mrf.mxu1 }
 0x234   : > { %v614_v35 = vmax.f32 %v1353_v48, %v1355_v49 }
 0x235   : > { %v1357_v50 = vpop.f32.mrf.mxu1 }
 0x237   : > { %v1359_v51 = vpop.f32.mrf.mxu1 }
 0x238   : > { %v617_v16 = vmax.f32 %v1357_v50, %v1359_v51 }
 0x239   : > { %v1361_v52 = vpop.f32.mrf.mxu1 }
 0x23b   : > { %v1363_v53 = vpop.f32.mrf.mxu1 }
 0x23c   : > { %v620_v30 = vmax.f32 %v1361_v52, %v1363_v53 }
 0x23d   : > { %v1365_v54 = vpop.f32.mrf.mxu1 }
 0x23f   : > { %v1367_v55 = vpop.f32.mrf.mxu1 }
 0x240   : > { %v623_v33 = vmax.f32 %v1365_v54, %v1367_v55 }
 0x241   : > { %v1369_v56 = vpop.f32.mrf.mxu1 }
 0x243   : > { %v1371_v57 = vpop.f32.mrf.mxu1 }
 0x244   : > { %v626_v22 = vmax.f32 %v1369_v56, %v1371_v57 }
 0x245   : > { %v1373_v58 = vpop.f32.mrf.mxu1 }
 0x247   : > { %v1375_v59 = vpop.f32.mrf.mxu1 }
 0x248   : > { %v629_v26 = vmax.f32 %v1373_v58, %v1375_v59 }
 0x249   : > { %v1377_v60 = vpop.f32.mrf.mxu1 }
 0x24b   : > { %v1379_v61 = vpop.f32.mrf.mxu1 }
 0x24c   : > { %v632_v18 = vmax.f32 %v1377_v60, %v1379_v61 }
 0x24d   : > { %v1381_v62 = vpop.f32.mrf.mxu1 }
 0x24f   : > { %v1383_v63 = vpop.f32.mrf.mxu1 }
 0x250   : > { %v635_v21 = vmax.f32 %v1381_v62, %v1383_v63 }
 0x251   : > { %v1385_v0 = vpop.f32.mrf.mxu1 }
 0x253   : > { %v1387_v1 = vpop.f32.mrf.mxu1 }
 0x254   : > { %v638_v12 = vmax.f32 %v1385_v0, %v1387_v1 }
 0x255   : > { %v1389_v2 = vpop.f32.mrf.mxu1 }
 0x257   : > { %v1391_v3 = vpop.f32.mrf.mxu1 }
 0x258   : > { %v641_v15 = vmax.f32 %v1389_v2, %v1391_v3 }
 0x259   : > { %v1393_v4 = vpop.f32.mrf.mxu1 }
 0x25b   : > { %v1395_v5 = vpop.f32.mrf.mxu1 }
 0x25c   : > { %v644_v6 = vmax.f32 %v1393_v4, %v1395_v5 }
 0x25d   : > { %v1399_v7 = vpop.f32.mrf.mxu1 }
 0x25e   : > { %645 = vmax.xlane.f32.xlu1 %v644_v6 }
 0x25f   : > { %v1401_v8 = vpop.f32.mrf.mxu1 }
 0x260   : > { %v647_v9 = vmax.f32 %v1399_v7, %v1401_v8 }
 0x261   : > { %v1405_v10 = vpop.f32.mrf.mxu1 }
 0x262   : > { %648 = vmax.xlane.f32.xlu1 %v647_v9 }
 0x263   : > { %v1407_v11 = vpop.f32.mrf.mxu1 }
 0x264   : > { %v650_v13 = vmax.f32 %v1405_v10, %v1407_v11 }
 0x265   : > { %v1413_v14 = vpop.f32.mrf.mxu1 }
 0x266   : > { %639 = vmax.xlane.f32.xlu1 %v638_v12  ;;  %651 = vmax.xlane.f32.xlu0 %v650_v13 }
 0x267   : > { %v1419_v17 = vpop.f32.mrf.mxu1 }
 0x268   : > { %v653_v20 = vmax.f32 %v1413_v14, %v1419_v17 }
 0x26a   : > { %642 = vmax.xlane.f32.xlu1 %v641_v15  ;;  %618 = vmax.xlane.f32.xlu0 %v617_v16 }
 0x26e   : > { %633 = vmax.xlane.f32.xlu1 %v632_v18  ;;  %612 = vmax.xlane.f32.xlu0 %v611_v19 }
 0x272   : > { %654 = vmax.xlane.f32.xlu1 %v653_v20 }
 0x276   : > { %636 = vmax.xlane.f32.xlu1 %v635_v21 }
 0x27a   : > { %627 = vmax.xlane.f32.xlu1 %v626_v22 }
 0x27e   : > { %630 = vmax.xlane.f32.xlu1 %v629_v26 }
 0x282   : > { %621 = vmax.xlane.f32.xlu1 %v620_v30 }
 0x286   : > { %624 = vmax.xlane.f32.xlu1 %v623_v33 }
 0x28a   : > { %615 = vmax.xlane.f32.xlu1 %v614_v35 }
 0x28e   : > { %609 = vmax.xlane.f32.xlu1 %v608_v36 }
 0x2e7   : > { %v646_v37 = vpop.xlane.xlu1 %645 }
 0x2eb   : > { %v649_v38 = vpop.xlane.xlu1 %648 }
 0x2ec   : > { %v682_v40 = vsub.f32 %v1399_v7, %v649_v38  ;;  %v683_v41 = vsub.f32 %v1401_v8, %v649_v38  ;;  %v680_v8 = vsub.f32 %v1393_v4, %v646_v37 }
 0x2ee   : > { %v740_v9 = vmul.f32 1.442695, %v682_v40  ;;  %v742_v16 = vmul.f32 1.442695, %v683_v41  ;;  %v736_v25 = vmul.f32 1.442695, %v680_v8 }
 0x2ef   : > { %v640_v39 = vpop.xlane.xlu1 %639  ;;  %v652_v23 = vpop.xlane.xlu0 %651 }
 0x2f0   : > { %v676_v12 = vsub.f32 %v1385_v0, %v640_v39  ;;  %v677_v18 = vsub.f32 %v1387_v1, %v640_v39  ;;  %v681_v0 = vsub.f32 %v1395_v5, %v646_v37  ;;  %v685_v5 = vsub.f32 %v1407_v11, %v652_v23 }
 0x2f2   : > { %v730_v22 = vmul.f32 1.442695, %v677_v18  ;;  %v738_v27 = vmul.f32 1.442695, %v681_v0  ;;  %v746_v32 = vmul.f32 1.442695, %v685_v5 }
 0x2f3   : > { %v643_v42 = vpop.xlane.xlu1 %642 }
 0x2f4   : > { %v678_v43 = vsub.f32 %v1389_v2, %v643_v42  ;;  %v679_v6 = vsub.f32 %v1391_v3, %v643_v42  ;;  %v728_v2 = vmul.f32 1.442695, %v676_v12  ;;  %v619_v42 = vpop.xlane.xlu0 %618 }
 0x2f6   : > { %v732_v13 = vmul.f32 1.442695, %v678_v43  ;;  %v734_v15 = vmul.f32 1.442695, %v679_v6 }
 0x2f7   : > { %v634_v19 = vpop.xlane.xlu1 %633 }
 0x2f8   : > { %1083 = vpow2.f32 %v732_v13  ;;  %v672_v20 = vsub.f32 %v1377_v60, %v634_v19  ;;  %v673_v7 = vsub.f32 %v1379_v61, %v634_v19  ;;  %v684_v61 = vsub.f32 %v1405_v10, %v652_v23  ;;  %v613_v0 = vpop.xlane.xlu0 %612 }
 0x2f9   : > { %1085 = vpow2.f32 %v734_v15  ;;  %v659_v5 = vsub.f32 %v1351_v47, %v613_v0 }
 0x2fa   : > { %1087 = vpow2.f32 %v740_v9  ;;  %v720_v3 = vmul.f32 1.442695, %v672_v20  ;;  %v722_v21 = vmul.f32 1.442695, %v673_v7  ;;  %v662_v7 = vsub.f32 %v1357_v50, %v619_v42 }
 0x2fb   : > { %1089 = vpow2.f32 %v742_v16  ;;  %v655_v24 = vpop.xlane.xlu1 %654 }
 0x2fc   : > { %1091 = vpow2.f32 %v720_v3  ;;  %v686_v1 = vsub.f32 %v1413_v14, %v655_v24  ;;  %v687_v60 = vsub.f32 %v1419_v17, %v655_v24  ;;  %v744_v14 = vmul.f32 1.442695, %v684_v61 }
 0x2fd   : > { %1093 = vpow2.f32 %v722_v21  ;;  %v663_v21 = vsub.f32 %v1359_v51, %v619_v42 }
 0x2fe   : > { %1095 = vpow2.f32 %v728_v2  ;;  %v748_v4 = vmul.f32 1.442695, %v686_v1  ;;  %v750_v26 = vmul.f32 1.442695, %v687_v60  ;;  %v700_v60 = vmul.f32 1.442695, %v662_v7 }
 0x2ff   : > { %1097 = vpow2.f32 %v730_v22  ;;  %v637_v28 = vpop.xlane.xlu1 %636 }
 0x300   : > { %1099 = vpow2.f32 %v748_v4  ;;  %v674_v29 = vsub.f32 %v1381_v62, %v637_v28  ;;  %v675_v30 = vsub.f32 %v1383_v63, %v637_v28 }
 0x301   : > { %1101 = vpow2.f32 %v750_v26 }
 0x302   : > { %1103 = vpow2.f32 %v736_v25  ;;  %v724_v17 = vmul.f32 1.442695, %v674_v29  ;;  %v726_v31 = vmul.f32 1.442695, %v675_v30  ;;  %v658_v25 = vsub.f32 %v1349_v46, %v613_v0 }
 0x303   : > { %1105 = vpow2.f32 %v738_v27  ;;  %v628_v10 = vpop.xlane.xlu1 %627  ;;  %v702_v27 = vmul.f32 1.442695, %v663_v21 }
 0x304   : > { %1107 = vpow2.f32 %v724_v17  ;;  %v668_v33 = vsub.f32 %v1369_v56, %v628_v10  ;;  %v669_v35 = vsub.f32 %v1371_v57, %v628_v10 }
 0x305   : > { %v1467_v11 = vpop.eup %1083  ;;  %1109 = vpow2.f32 %v726_v31 }
 0x306   : > { %v1469_v36 = vpop.eup %1085  ;;  %1111 = vpow2.f32 %v744_v14  ;;  %v712_v62 = vmul.f32 1.442695, %v668_v33  ;;  %v714_v37 = vmul.f32 1.442695, %v669_v35  ;;  %v692_v14 = vmul.f32 1.442695, %v658_v25 }
 0x307   : > { %v1471_v63 = vpop.eup %1087  ;;  %1113 = vpow2.f32 %v746_v32  ;;  %v631_v38 = vpop.xlane.xlu1 %630  ;;  %v785_v39 = vadd.f32 %v1469_v36, %v1467_v11  ;;  %v694_v32 = vmul.f32 1.442695, %v659_v5  ;;  %v341_v25 = vld [vmem:[%s1639_s2 + $0x18] sm:$0xff] }
 0x308   : > { %v1475_v40 = vpop.eup %1089  ;;  %v670_v56 = vsub.f32 %v1373_v58, %v631_v38  ;;  %v671_v57 = vsub.f32 %v1375_v59, %v631_v38  ;;  %1115 = vpow2.f32 %v712_v62 }
 0x309   : > { %v1479_v41 = vpop.eup %1091  ;;  %786 = vadd.xlane.f32.xlu0 %v785_v39  ;;  %1117 = vpow2.f32 %v714_v37  ;;  %v791_v15 = vadd.f32 %v1475_v40, %v1471_v63 }
 0x30a   : > { %v1481_v43 = vpop.eup %1093  ;;  %v716_v6 = vmul.f32 1.442695, %v670_v56  ;;  %v718_v9 = vmul.f32 1.442695, %v671_v57 }
 0x30b   : > { %v1483_v12 = vpop.eup %1095  ;;  %v622_v13 = vpop.xlane.xlu1 %621  ;;  %v776_v58 = vadd.f32 %v1481_v43, %v1479_v41 }
 0x30c   : > { %v1489_v59 = vpop.eup %1097  ;;  %1119 = vpow2.f32 %v716_v6  ;;  %v664_v16 = vsub.f32 %v1361_v52, %v622_v13  ;;  %v665_v18 = vsub.f32 %v1363_v53, %v622_v13 }
 0x30d   : > { %v1493_v19 = vpop.eup %1099  ;;  %1121 = vpow2.f32 %v718_v9  ;;  %792 = vadd.xlane.f32.xlu0 %v791_v15  ;;  %777 = vadd.xlane.f32.xlu1 %v776_v58  ;;  %v782_v52 = vadd.f32 %v1489_v59, %v1483_v12 }
 0x30e   : > { %v1495_v20 = vpop.eup %1101  ;;  %v704_v8 = vmul.f32 1.442695, %v664_v16  ;;  %v706_v2 = vmul.f32 1.442695, %v665_v18 }
 0x30f   : > { %v1498_v3 = vpop.eup %1103  ;;  %v625_v22 = vpop.xlane.xlu1 %624  ;;  %v797_v53 = vadd.f32 %v1495_v20, %v1493_v19 }
 0x310   : > { %v1505_v23 = vpop.eup %1105  ;;  %1123 = vpow2.f32 %v704_v8  ;;  %v666_v24 = vsub.f32 %v1365_v54, %v625_v22  ;;  %v667_v50 = vsub.f32 %v1367_v55, %v625_v22 }
 0x311   : > { %v1509_v1 = vpop.eup %1107  ;;  %1125 = vpow2.f32 %v706_v2  ;;  %783 = vadd.xlane.f32.xlu1 %v782_v52  ;;  %798 = vadd.xlane.f32.xlu0 %v797_v53  ;;  %v788_v55 = vadd.f32 %v1505_v23, %v1498_v3 }
 0x312   : > { %v1511_v51 = vpop.eup %1109  ;;  %v708_v61 = vmul.f32 1.442695, %v666_v24  ;;  %v710_v4 = vmul.f32 1.442695, %v667_v50  ;;  %v338_v24 = vld [vmem:[%s1639_s2] sm:$0xff]  ;;  %v340_v50 = vld [vmem:[%s1639_s2 + $0x10] sm:$0xff] }
 0x313   : > { %v1514_v26 = vpop.eup %1111  ;;  %v616_v54 = vpop.xlane.xlu1 %615  ;;  %v779_v28 = vadd.f32 %v1511_v51, %v1509_v1 }
 0x314   : > { %v1521_v29 = vpop.eup %1113  ;;  %1127 = vpow2.f32 %v708_v61  ;;  %v660_v30 = vsub.f32 %v1353_v48, %v616_v54  ;;  %v661_v46 = vsub.f32 %v1355_v49, %v616_v54 }
 0x315   : > { %1129 = vpow2.f32 %v710_v4  ;;  %789 = vadd.xlane.f32.xlu1 %v788_v55  ;;  %780 = vadd.xlane.f32.xlu0 %v779_v28  ;;  %v1525_v31 = vpop.eup %1115  ;;  %v794_v33 = vadd.f32 %v1521_v29, %v1514_v26 }
 0x316   : > { %1131 = vpow2.f32 %v700_v60  ;;  %v696_v47 = vmul.f32 1.442695, %v660_v30  ;;  %v698_v17 = vmul.f32 1.442695, %v661_v46  ;;  %v1529_v35 = vpop.eup %1117  ;;  %v339_v60 = vld [vmem:[%s1639_s2 + $0x8] sm:$0xff] }
 0x317   : > { %1133 = vpow2.f32 %v702_v27  ;;  %v610_v10 = vpop.xlane.xlu1 %609  ;;  %v770_v56 = vadd.f32 %v1529_v35, %v1525_v31 }
 0x318   : > { %1135 = vpow2.f32 %v696_v47  ;;  %v656_v48 = vsub.f32 %v1345_v44, %v610_v10  ;;  %v657_v49 = vsub.f32 %v1347_v45, %v610_v10 }
 0x319   : > { %v1533_v62 = vpop.eup %1119  ;;  %1137 = vpow2.f32 %v698_v17  ;;  %795 = vadd.xlane.f32.xlu1 %v794_v33 }
 0x31a   : > { %v1535_v37 = vpop.eup %1121  ;;  %1139 = vpow2.f32 %v692_v14  ;;  %v688_v38 = vmul.f32 1.442695, %v656_v48  ;;  %v690_v39 = vmul.f32 1.442695, %v657_v49 }
 0x31b   : > { %1141 = vpow2.f32 %v694_v32  ;;  %v773_v57 = vadd.f32 %v1535_v37, %v1533_v62 }
 0x31c   : > { %1143 = vpow2.f32 %v688_v38 }
 0x31d   : > { %v1541_v44 = vpop.eup %1123  ;;  %1145 = vpow2.f32 %v690_v39  ;;  %771 = vadd.xlane.f32.xlu1 %v770_v56  ;;  %774 = vadd.xlane.f32.xlu0 %v773_v57 }
 0x31e   : > { %v1543_v45 = vpop.eup %1125 }
 0x31f   : > { %v764_v42 = vadd.f32 %v1543_v45, %v1541_v44 }
 0x321   : > { %v1547_v6 = vpop.eup %1127  ;;  %765 = vadd.xlane.f32.xlu1 %v764_v42 }
 0x322   : > { %v1549_v9 = vpop.eup %1129 }
 0x323   : > { %v1551_v13 = vpop.eup %1131  ;;  %v767_v15 = vadd.f32 %v1549_v9, %v1547_v6 }
 0x324   : > { %v1555_v58 = vpop.eup %1133 }
 0x325   : > { %v1557_v16 = vpop.eup %1135  ;;  %768 = vadd.xlane.f32.xlu0 %v767_v15  ;;  %v761_v8 = vadd.f32 %v1555_v58, %v1551_v13 }
 0x326   : > { %v1559_v18 = vpop.eup %1137 }
 0x327   : > { %v1561_v7 = vpop.eup %1139  ;;  %v758_v2 = vadd.f32 %v1559_v18, %v1557_v16 }
 0x328   : > { %v1567_v21 = vpop.eup %1141 }
 0x329   : > { %v1569_v0 = vpop.eup %1143  ;;  %762 = vadd.xlane.f32.xlu0 %v761_v8  ;;  %759 = vadd.xlane.f32.xlu1 %v758_v2  ;;  %v755_v52 = vadd.f32 %v1567_v21, %v1561_v7 }
 0x32a   : > { %v1571_v22 = vpop.eup %1145 }
 0x32b   : > { %v752_v53 = vadd.f32 %v1571_v22, %v1569_v0 }
 0x32d   : > { %756 = vadd.xlane.f32.xlu0 %v755_v52  ;;  %753 = vadd.xlane.f32.xlu1 %v752_v53 }
 0x33e   : > { %344 = vperm.xlu1 %1075, %v338_v24  }
 0x342   : > { %354 = vperm.xlu1 %1075, %v340_v50  }
 0x343   : > { %349 = vperm.xlu0 %1076, %v339_v60  }
 0x346   : > { %359 = vperm.xlu1 %1075, %v341_v25  }
 0x392   : > { %v787_v61 = vpop.xlane.xlu0 %786 }
 0x396   : > { %v778_v4 = vpop.xlane.xlu1 %777  ;;  %v793_v27 = vpop.xlane.xlu0 %792 }
 0x39a   : > { %v784_v5 = vpop.xlane.xlu1 %783  ;;  %v799_v54 = vpop.xlane.xlu0 %798 }
 0x39b   : > { %1147 = vrcp.f32 %v799_v54 }
 0x39e   : > { %v790_v55 = vpop.xlane.xlu1 %789  ;;  %v781_v30 = vpop.xlane.xlu0 %780 }
 0x39f   : > { %1149 = vrcp.f32 %v790_v55 }
 0x3a0   : > { %1151 = vrcp.f32 %v793_v27 }
 0x3a2   : > { %v796_v28 = vpop.xlane.xlu1 %795 }
 0x3a3   : > { %1153 = vrcp.f32 %v796_v28  ;;  %v1039_v28 = vpop.f32.mrf.mxu0 }
 0x3a4   : > { %1155 = vrcp.f32 %v784_v5 }
 0x3a5   : > { %1157 = vrcp.f32 %v787_v61 }
 0x3a6   : > { %v772_v46 = vpop.xlane.xlu1 %771  ;;  %1159 = vrcp.f32 %v781_v30  ;;  %v775_v14 = vpop.xlane.xlu0 %774 }
 0x3a7   : > { %1161 = vrcp.f32 %v778_v4 }
 0x3a8   : > { %1163 = vrcp.f32 %v775_v14  ;;  %v1148_v47 = vpop.eup %1147 }
 0x3a9   : > { %1165 = vrcp.f32 %v772_v46  ;;  %v847_v49 = vmul.f32 %v1148_v47, %v1495_v20  ;;  %v846_v38 = vmul.f32 %v1148_v47, %v1493_v19 }
 0x3aa   : > { %v766_v32 = vpop.xlane.xlu1 %765 }
 0x3ac   : > { %v1150_v17 = vpop.eup %1149 }
 0x3ad   : > { %v1152_v33 = vpop.eup %1151  ;;  %v841_v57 = vmul.f32 %v1150_v17, %v1505_v23  ;;  %v840_v20 = vmul.f32 %v1150_v17, %v1498_v3 }
 0x3ae   : > { %v769_v10 = vpop.xlane.xlu0 %768  ;;  %v843_v53 = vmul.f32 %v1152_v33, %v1475_v40  ;;  %v842_v60 = vmul.f32 %v1152_v33, %v1471_v63 }
 0x3af   : > { %1167 = vrcp.f32 %v769_v10 }
 0x3b0   : > { %v1154_v48 = vpop.eup %1153  ;;  %1169 = vrcp.f32 %v766_v32  ;;  %v861_v19 = vpack.c.bf16 %v843_v53, %v841_v57  ;;  %v860_v40 = vpack.c.bf16 %v842_v60, %v840_v20 }
 0x3b1   : > { %v845_v39 = vmul.f32 %v1154_v48, %v1521_v29  ;;  %v844_v56 = vmul.f32 %v1154_v48, %v1514_v26  ;;  %v1156_v42 = vpop.eup %1155 }
 0x3b2   : > { %v763_v15 = vpop.xlane.xlu0 %762  ;;  %v760_v8 = vpop.xlane.xlu1 %759  ;;  %v837_v29 = vmul.f32 %v1156_v42, %v1489_v59  ;;  %v836_v4 = vmul.f32 %v1156_v42, %v1483_v12 }
 0x3b3   : > { %v863_v2 = vpack.c.bf16 %v847_v49, %v845_v39  ;;  %v862_v52 = vpack.c.bf16 %v846_v38, %v844_v56  ;;  %v1158_v24 = vpop.eup %1157  ;;  %1171 = vrcp.f32 %v763_v15 }
 0x3b4   : > { %1173 = vrcp.f32 %v760_v8  ;;  %v1160_v26 = vpop.eup %1159  ;;  %v839_v25 = vmul.f32 %v1158_v24, %v1469_v36  ;;  %v838_v54 = vmul.f32 %v1158_v24, %v1467_v11  ;;  %v413_v11 = vpop.f32.mrf.mxu0 }
 0x3b5   : > { %874 = vmatprep.subr.bf16.mxu0 %v863_v2  ;;  %v1162_v61 = vpop.eup %1161  ;;  %v835_v5 = vmul.f32 %v1160_v26, %v1511_v51  ;;  %v834_v36 = vmul.f32 %v1160_v26, %v1509_v1 }
 0x3b6   : > { %v757_v50 = vpop.xlane.xlu0 %756  ;;  %v754_v23 = vpop.xlane.xlu1 %753  ;;  %875 = vmatpush1.bf16.msra.mxu0 %v862_v52  ;;  %v859_v27 = vpack.c.bf16 %v839_v25, %v837_v29  ;;  %v833_v63 = vmul.f32 %v1162_v61, %v1481_v43  ;;  %v858_v55 = vpack.c.bf16 %v838_v54, %v836_v4  ;;  %v832_v51 = vmul.f32 %v1162_v61, %v1479_v41  ;;  %v867_v54 = vld [vmem:[#allocation6 + $0x18] sm:$0xff] }
 0x3b7   : > { %876 = vmatprep.subr.bf16.mxu0 %v861_v19  ;;  %1175 = vrcp.f32 %v757_v50  ;;  %v1164_v3 = vpop.eup %1163  ;;  %v1040_v49 = vpop.f32.mrf.mxu0 }
 0x3b8   : > { %1177 = vrcp.f32 %v754_v23  ;;  %v1166_v59 = vpop.eup %1165  ;;  %v857_v30 = vpack.c.bf16 %v835_v5, %v833_v63  ;;  %v831_v12 = vmul.f32 %v1164_v3, %v1535_v37  ;;  %v856_v17 = vpack.c.bf16 %v834_v36, %v832_v51 }
 0x3b9   : > { %v829_v46 = vmul.f32 %v1166_v59, %v1529_v35  ;;  %v828_v32 = vmul.f32 %v1166_v59, %v1525_v31  ;;  %v830_v43 = vmul.f32 %v1164_v3, %v1533_v62  ;;  %v416_v15 = vpop.f32.mrf.mxu0 }
 0x3ba   : > { %877 = vmatpush1.bf16.msra.mxu0 %v860_v40  ;;  %v345_v37 = vpop.permute.xlu1 %344  ;;  %v865_v40 = vld [vmem:[#allocation6 + $0x8] sm:$0xff] }
 0x3bb   : > { %878 = vmatprep.subr.bf16.mxu0 %v859_v27  ;;  %v855_v33 = vpack.c.bf16 %v831_v12, %v829_v46  ;;  %v854_v41 = vpack.c.bf16 %v830_v43, %v828_v32  ;;  %v866_v27 = vld [vmem:[#allocation6 + $0x10] sm:$0xff] }
 0x3bc   : > { %v1168_v14 = vpop.eup %1167 }
 0x3bd   : > { %v1170_v47 = vpop.eup %1169  ;;  %v827_v1 = vmul.f32 %v1168_v14, %v1549_v9  ;;  %v826_v38 = vmul.f32 %v1168_v14, %v1547_v6  ;;  %v870_v14 = vld [vmem:[#allocation6 + $0x30] sm:$0xff] }
 0x3be   : > { %879 = vmatpush1.bf16.msra.mxu0 %v858_v55  ;;  %v825_v35 = vmul.f32 %v1170_v47, %v1543_v45  ;;  %v824_v9 = vmul.f32 %v1170_v47, %v1541_v44  ;;  %v350_v42 = vpop.permute.xlu0 %349 }
 0x3bf   : > { %880 = vmatprep.subr.bf16.mxu0 %v857_v30  ;;  %v417_v24 = vadd.f32 %v416_v15, %v350_v42  ;;  %v869_v30 = vld [vmem:[#allocation6 + $0x28] sm:$0xff] }
 0x3c0   : > { %v1172_v10 = vpop.eup %1171  ;;  %v853_v56 = vpack.c.bf16 %v827_v1, %v825_v35  ;;  %v852_v8 = vpack.c.bf16 %v826_v38, %v824_v9 }
 0x3c1   : > { %v1174_v48 = vpop.eup %1173  ;;  %v823_v62 = vmul.f32 %v1172_v10, %v1555_v58  ;;  %v822_v2 = vmul.f32 %v1172_v10, %v1551_v13  ;;  %v414_v58 = vadd.f32 %v413_v11, %v345_v37  ;;  %v429_v26 = vmax.f32 %v417_v24, 0.0 }
 0x3c2   : > { %881 = vmatpush1.bf16.msra.mxu0 %v856_v17  ;;  %v821_v31 = vmul.f32 %v1174_v48, %v1559_v18  ;;  %v820_v45 = vmul.f32 %v1174_v48, %v1557_v16  ;;  %v355_v18 = vpop.permute.xlu1 %354  ;;  %v871_v17 = vld [vmem:[#allocation6 + $0x38] sm:$0xff] }
 0x3c3   : > { %882 = vmatprep.subr.bf16.mxu0 %v855_v33  ;;  %v428_v16 = vmax.f32 %v414_v58, 0.0 }
 0x3c4   : > { %v1176_v39 = vpop.eup %1175  ;;  %v851_v52 = vpack.c.bf16 %v823_v62, %v821_v31  ;;  %v850_v20 = vpack.c.bf16 %v822_v2, %v820_v45 }
 0x3c5   : > { %v1178_v57 = vpop.eup %1177  ;;  %v819_v53 = vmul.f32 %v1176_v39, %v1567_v21  ;;  %v818_v19 = vmul.f32 %v1176_v39, %v1561_v7  ;;  %v872_v23 = vpack.c.bf16 %v429_v26, %v428_v16 }
 0x3c6   : > { %883 = vmatpush1.bf16.msra.mxu0 %v854_v41  ;;  %v817_v6 = vmul.f32 %v1178_v57, %v1571_v22  ;;  %v816_v44 = vmul.f32 %v1178_v57, %v1569_v0  ;;  %v360_v13 = vpop.permute.xlu1 %359  ;;  %v422_v22 = vadd.f32 %v1039_v28, %v355_v18  ;;  %v864_v0 = vld [vmem:[#allocation6] sm:$0xff] }
 0x3c7   : > { %884 = vmatprep.subr.bf16.mxu0 %v853_v56  ;;  %v425_v21 = vadd.f32 %v1040_v49, %v360_v13  ;;  %v868_v28 = vld [vmem:[#allocation6 + $0x20] sm:$0xff] }
 0x3c8   : > { %v849_v29 = vpack.c.bf16 %v819_v53, %v817_v6  ;;  %v848_v50 = vpack.c.bf16 %v818_v19, %v816_v44  ;;  %v430_v60 = vmax.f32 %v422_v22, 0.0 }
 0x3c9   : > { %v431_v25 = vmax.f32 %v425_v21, 0.0 }
 0x3ca   : > { %885 = vmatpush1.bf16.msra.mxu0 %v852_v8 }
 0x3cb   : > { %886 = vmatprep.subr.bf16.mxu0 %v851_v52  ;;  %v873_v61 = vpack.c.bf16 %v431_v25, %v430_v60 }
 0x3ce   : > { %887 = vmatpush1.bf16.msra.mxu0 %v850_v20 }
 0x3cf   : > { %888 = vmatprep.subr.bf16.mxu0 %v849_v29 }
 0x3d2   : > { %889 = vmatpush1.bf16.msra.mxu0 %v848_v50 }
 0x3d5   : > { %907 = vmatmul.mubr.bf16.vlgmr.msra.gmra.mxu0 %v872_v23 }
 0x3d6   : > { %916 = vmatprep.mubr.bf16.mxu0 %v1249_v34 }
 0x3dd   : > { %917 = vmatmul.mubr.bf16.gmra.mxu0 %v873_v61 }
 0x495   : > { %v908_v7 = vpop.f32.mrf.mxu0 }
 0x496   : > { %v927_v4 = vadd.f32 %v908_v7, %v864_v0 }
 0x497   : > { %v910_v3 = vpop.f32.mrf.mxu0 }
 0x498   : > { %935 = vst [vmem:[#allocation6] sm:$0xff] %v927_v4  ;;  %v928_v5 = vadd.f32 %v910_v3, %v865_v40 }
 0x499   : > { %v912_v59 = vpop.f32.mrf.mxu0 }
 0x49a   : > { %936 = vst [vmem:[#allocation6 + $0x8] sm:$0xff] %v928_v5  ;;  %v929_v63 = vadd.f32 %v912_v59, %v866_v27 }
 0x49b   : > { %v914_v55 = vpop.f32.mrf.mxu0 }
 0x49c   : > { %937 = vst [vmem:[#allocation6 + $0x10] sm:$0xff] %v929_v63  ;;  %v930_v34 = vadd.f32 %v914_v55, %v867_v54 }
 0x49d   : > { %v918_v36 = vpop.f32.mrf.mxu0 }
 0x49e   : > { %938 = vst [vmem:[#allocation6 + $0x18] sm:$0xff] %v930_v34  ;;  %v931_v46 = vadd.f32 %v918_v36, %v868_v28 }
 0x49f   : > { %v920_v12 = vpop.f32.mrf.mxu0 }
 0x4a0   : > { %939 = vst [vmem:[#allocation6 + $0x20] sm:$0xff] %v931_v46  ;;  %v932_v51 = vadd.f32 %v920_v12, %v869_v30 }
 0x4a1   : > { %v922_v47 = vpop.f32.mrf.mxu0 }
 0x4a2   : > { %940 = vst [vmem:[#allocation6 + $0x28] sm:$0xff] %v932_v51  ;;  %v933_v11 = vadd.f32 %v922_v47, %v870_v14 }
 0x4a3   : > { %v924_v32 = vpop.f32.mrf.mxu0 }
 0x4a4   : > { %941 = vst [vmem:[#allocation6 + $0x30] sm:$0xff] %v933_v11  ;;  %v934_v43 = vadd.f32 %v924_v32, %v871_v17 }
 0x4a6   : > { %942 = vst [vmem:[#allocation6 + $0x38] sm:$0xff] %v934_v43 }
 0x4a7   : > { %1218 = shalt.err (!%p1215_p8)
}
 0x4a8   : > { %s1251_s7 = smov 256   ;;  %s1252_s8 = smov 16  }
 0x4a9   : > { %1046 = dma.vmem_to_hbm [thread:$0]  (%p1055_p1), %s950_s30, 1024, %s1642_s5, [#allocation5], %s1251_s7, %s1251_s7, %s1252_s8  }
 0x4aa   : > { %1238 = dma.done.wait (%p1055_p1), [#allocation5], 1024  }
 0x4ab   : > { %1240 = vsyncadd (%p1055_p1), [#allocation5], 4294966272 }
 0x4ac PF: > { %s17_s18 = sadd.s32 1, %s1243_s18  }
 0x4ad   : > { %p14_p9 = scmp.ge.s32.totalorder %s17_s18, 4  }
 0x4af   :  { %16 = sbr.rel (!%p14_p9) target bundleno = 2 (0x2), region = 75 }
 0x4b4   :  { %965 = vsyncpa [#allocation4], 1 }
 0x4b5   :  { %967 = vsyncpa [#allocation4 + $0x1], 1 }
 0x4b6   :  { %968 = vsyncpa [#allocation5], 1 }
 0x4b7   :  { %970 = vsyncpa [#allocation5 + $0x1], 1 }

// kernel: tpu_custom_call.1
= control target key start
LH: loop header
LB: loop body
LE: loop exit
PB: predicated region body
PF: predicated region fallthrough
CT: control target
= control target key end

     0   :  { %10 = vsyncpa [#allocation4], 0  ;;  %s1637_s0 = inlined_call_operand.hbm [shape: f32[32,256], index: 0, kind: input, shape index: {}, may-alias: {0,5}]   ;;  %s1638_s1 = inlined_call_operand.vmem [shape: bf16[32,32], index: 1, kind: input, shape index: {}]   ;;  %s1639_s2 = inlined_call_operand.vmem [shape: f32[32,1], index: 2, kind: input, shape index: {}]   ;;  %s1640_s3 = inlined_call_operand.vmem [shape: bf16[16,32], index: 3, kind: input, shape index: {}]   ;;  %s1641_s4 = inlined_call_operand.vmem [shape: f32[16,1], index: 4, kind: input, shape index: {}]   ;;  %s1642_s5 = inlined_call_operand.hbm [shape: f32[32,256], index: 5, kind: output, shape index: {}, may-alias: {0,5}]  }
   0x1   :  { %11 = vsyncpa [#allocation5], 0  ;;  %s1283_s18 = smov 0  }
   0x2 LB: > { %s1289_s19 = sadd.s32 4294967295, %s1243_s18   ;;  %p996_p0 = scmp.ge.s32.totalorder %s1243_s18, 1  ;;  %s1243_s18 = sphi %s1283_s18, %s17_s18  }
   0x3   : > { %p148_p1 = scmp.lt.s32.totalorder %s1243_s18, 3  ;;  %s1245_s20 = smov [#allocation3]  }
   0x4   : > { %s160_s21 = sshll.u32 %s1245_s20, 4  ;;  %p1053_p4 = scmp.eq.s32.totalorder %s1289_s19, 0  ;;  %s161_s21 = int_to_ptr.vmem [resolvable:$true] %s160_s21 }
   0x5   : > { %p1294_p3 = pnand %p996_p0, %p148_p1  ;;  %s1190_s23 = scalar_lea.vmem %s161_s21, 1024 }
   0x6   : > { %p1191_p8 = scmp.ne.s32.totalorder %s161_s21, %s1190_s23  ;;  %p1198_p11 = scmp.lt.s32.totalorder %s161_s21, %s161_s21 }
   0x7   : > { %p1049_p5 = pneg %p1294_p3  ;;  %p1199_p12 = scmp.lt.s32.totalorder %s1190_s23, %s1190_s23 }
   0x9   : > { %p1050_p6 = pnand %p1053_p4, %p1049_p5  ;;  %p1200_p13 = por %p1199_p12, %p1198_p11 }
   0xb   : > { %p1181_p7 = pneg %p1050_p6 }
   0xd   : > { %p1193_p9 = pnand %p1191_p8, %p1181_p7 }
   0xf   : > { %p1194_p10 = pneg %p1193_p9 }
  0x11   : > { %p1201_p2 = pnand %p1200_p13, %p1194_p10 }
  0x13   : > { %1204 = shalt.err (!%p1201_p2)
}
  0x14   : > { %s1246_s24 = smov 256   ;;  %s1247_s25 = smov 16  }
  0x15   : > { %1052 = dma.hbm_to_vmem [thread:$0]  (!%p1050_p6), %s1637_s0, 1024, %s161_s21, [#allocation4], %s1246_s24, %s1246_s24, %s1247_s25  }
  0x16   : > { %188 = sbr.rel (%p1294_p3) target bundleno = 1196 (0x4ac), region = 40 }
  0x1b   : > { %1234 = dma.done.wait (%p1053_p4), [#allocation4], 1024  }
  0x1c   : > { %1236 = vsyncadd (%p1053_p4), [#allocation4], 4294966272  ;;  %p1644_p0 = scmp.ne.s32.totalorder %s1289_s19, 0 }
  0x1e   : > { %210 = sbr.rel (%p1644_p0) target bundleno = 254 (0xfe), region = 48 }
  0x23   : > { %v211_v0 = vld [vmem:[#allocation3] sm:$0xff]  ;;  %v212_v1 = vld [vmem:[#allocation3 + $0x8] sm:$0xff]  ;;  %v213_v2 = vld [vmem:[#allocation3 + $0x10] sm:$0xff]  ;;  %v1248_v6 = vmov 0   ;;  %vm258_vm0 = vcmask 261120  }
  0x24   : > { %v214_v3 = vld [vmem:[#allocation3 + $0x18] sm:$0xff]  ;;  %v215_v4 = vld [vmem:[#allocation3 + $0x20] sm:$0xff]  ;;  %v216_v5 = vld [vmem:[#allocation3 + $0x28] sm:$0xff]  ;;  %219 = vst [vmem:[#allocation6] sm:$0xff] %v211_v0  ;;  %294 = vmatprep.mubr.bf16.mxu0 %v1248_v6  ;;  %1073 = vset.pattern.permute.xlu0 %v1248_v6  ;;  %v237_v14 = vpack.c.bf16 %v213_v2, %v211_v0 }
  0x25   : > { %220 = vst [vmem:[#allocation6 + $0x8] sm:$0xff] %v212_v1  ;;  %221 = vst [vmem:[#allocation6 + $0x10] sm:$0xff] %v213_v2  ;;  %v217_v7 = vld [vmem:[#allocation3 + $0x30] sm:$0xff]  ;;  %v218_v8 = vld [vmem:[#allocation3 + $0x38] sm:$0xff]  ;;  %v238_v11 = vpack.c.bf16 %v214_v3, %v212_v1 }
  0x26   : > { %222 = vst [vmem:[#allocation6 + $0x18] sm:$0xff] %v214_v3  ;;  %223 = vst [vmem:[#allocation6 + $0x20] sm:$0xff] %v215_v4  ;;  %v240_v9 = vpack.c.bf16 %v218_v8, %v216_v5  ;;  %v239_v10 = vpack.c.bf16 %v217_v7, %v215_v4  ;;  %v241_v12 = vld [vmem:[%s1641_s4] sm:$0xff]  ;;  %v242_v13 = vld [vmem:[%s1641_s4 + $0x8] sm:$0xff] }
  0x27   : > { %224 = vst [vmem:[#allocation6 + $0x28] sm:$0xff] %v216_v5  ;;  %225 = vst [vmem:[#allocation6 + $0x30] sm:$0xff] %v217_v7  ;;  %245 = vperm.xlu0 %1073, %v241_v12   ;;  %v1074_v15 = vld [vmem:[%s1640_s3] sm:$0xff]  }
  0x28   : > { %226 = vst [vmem:[#allocation6 + $0x38] sm:$0xff] %v218_v8  ;;  %274 = vmatprep.subr.bf16.mxu0 %v240_v9 }
  0x29   : > { %275 = vmatpush1.bf16.msra.mxu0 %v239_v10 }
  0x2a   : > { %276 = vmatprep.subr.bf16.mxu0 %v238_v11 }
  0x2b   : > { %250 = vperm.xlu0 %1073, %v242_v13  }
  0x2d   : > { %277 = vmatpush1.bf16.msra.mxu0 %v237_v14 }
  0x30   : > { %1002 = vmatmul.mubr.msk.bf16.vlgmr.msra.gmra.mxu0 %vm258_vm0, %v1074_v15 }
  0xa2   : > { %v246_v16 = vpop.permute.xlu0 %245 }
  0xa6   : > { %v251_v21 = vpop.permute.xlu0 %250 }
  0xf0   : > { %v296_v17 = vpop.f32.mrf.mxu0 }
  0xf1   : > { %v297_v18 = vadd.f32 %v296_v17, %v246_v16 }
  0xf2   : > { %v298_v19 = vpop.f32.mrf.mxu0 }
  0xf3   : > { %v299_v20 = vadd.f32 %v298_v19, %v246_v16  ;;  %v305_v23 = vmax.f32 %v297_v18, 0.0 }
  0xf4   : > { %v300_v22 = vpop.f32.mrf.mxu0 }
  0xf5   : > { %v306_v24 = vmax.f32 %v299_v20, 0.0  ;;  %v301_v25 = vadd.f32 %v300_v22, %v251_v21 }
  0xf6   : > { %v302_v26 = vpop.f32.mrf.mxu0 }
  0xf7   : > { %v1027_v27 = vpack.c.bf16 %v306_v24, %v305_v23  ;;  %v303_v28 = vadd.f32 %v302_v26, %v251_v21  ;;  %v307_v29 = vmax.f32 %v301_v25, 0.0 }
  0xf9   : > { %321 = vst [vmem:[#allocation2] sm:$0xff] %v1027_v27  ;;  %v308_v30 = vmax.f32 %v303_v28, 0.0 }
  0xfb   : > { %v1028_v31 = vpack.c.bf16 %v308_v30, %v307_v29 }
  0xfd   : > { %322 = vst [vmem:[#allocation2 + $0x8] sm:$0xff] %v1028_v31 }
  0xfe PF: > { %s1005_s9 = sshll.u32 %s1289_s19, 7  ;;  %v1249_v34 = vmov 0   ;;  %vm470_vm1 = vcmask 130048   ;;  %v1081_v31 = vld [vmem:[%s1638_s1] sm:$0xff]   ;;  %vm372_vm2 = vcmask 261120   ;;  %s1250_s29 = smov [#allocation6]  }
  0xff   : > { %s1324_s10 = sshra.s32 %s1005_s9, 7  ;;  %527 = vmatprep.mubr.bf16.mxu1 %v1249_v34  ;;  %1075 = vset.pattern.permute.xlu1 %v1249_v34  ;;  %s949_s30 = sshll.u32 %s1250_s29, 4  ;;  %s950_s30 = int_to_ptr.vmem [resolvable:$true] %s949_s30 }
 0x100   : > { %s1011_s11 = sshll.u32 %s1324_s10, 2  ;;  %s1006_s13 = sshll.u32 %s1324_s10, 3  ;;  %1037 = vmatprep.mubr.msk.bf16.mxu0 %vm372_vm2, %v1081_v31 }
 0x101   : > { %s433_s12 = scalar_lea.vmem [#allocation2], %s1011_s11  ;;  %s327_s14 = scalar_lea.vmem [#allocation3], %s1006_s13 }
 0x102   : > { %v330_v23 = vld [vmem:[%s327_s14 + $0x20] sm:$0xff]  ;;  %v331_v24 = vld [vmem:[%s327_s14 + $0x30] sm:$0xff]  ;;  %p1055_p1 = scmp.eq.s32.totalorder %s1289_s19, 1  ;;  %s1205_s6 = scalar_lea.vmem %s950_s30, 1024 }
 0x103   : > { %v333_v25 = vpack.c.bf16 %v331_v24, %v330_v23  ;;  %v328_v27 = vld [vmem:[%s327_s14] sm:$0xff]  ;;  %v329_v28 = vld [vmem:[%s327_s14 + $0x10] sm:$0xff]  ;;  %p1206_p2 = scmp.ne.s32.totalorder %s950_s30, %s1205_s6  ;;  %p1212_p5 = scmp.lt.s32.totalorder %s950_s30, %s950_s30 }
 0x104   : > { %v1078_v32 = vld [vmem:[#allocation2 + $0x4] ss:$8 sps:$4 sm:$0xff]   ;;  %v1080_v33 = vld [vmem:[#allocation2] ss:$8 sps:$4 sm:$0xff]   ;;  %v332_v29 = vpack.c.bf16 %v329_v28, %v328_v27  ;;  %p1213_p6 = scmp.lt.s32.totalorder %s1205_s6, %s1205_s6 }
 0x105   : > { %509 = vmatprep.subr.bf16.mxu1 %v1078_v32  ;;  %v1077_v35 = vld [vmem:[%s433_s12] ss:$8 sps:$4 sm:$0xff]   ;;  %1033 = vmatprep.subr.bf16.mxu0 %v333_v25  ;;  %p1207_p3 = pnand %p1206_p2, %p1055_p1 }
 0x106   : > { %510 = vmatpush1.bf16.msra.mxu1 %v1080_v33  ;;  %444 = vxpose.xlu0.c.b16.start.end [1/1] (short) %v1077_v35, 128  ;;  %v1082_v32 = vld [vmem:[%s1638_s1 + $0x8] sm:$0xff]   ;;  %p1214_p7 = por %p1213_p6, %p1212_p5 }
 0x107   : > { %1034 = vmatpush3.bf16.msra.mxu0 %v333_v25  ;;  %p1208_p4 = pneg %p1207_p3 }
 0x108   : > { %1035 = vmatprep.subr.bf16.mxu0 %v332_v29 }
 0x109   : > { %p1215_p8 = pnand %p1214_p7, %p1208_p4 }
 0x10b   : > { %1036 = vmatpush3.bf16.msra.mxu0 %v332_v29 }
 0x10e   : > { %1038 = vmatmul.mubr.msk.bf16.vlgmr.msra.gmra.mxu0 %vm372_vm2, %v1082_v32 }
 0x10f   : > { %1076 = vset.pattern.permute.xlu0 %v1249_v34  ;;  %906 = vmatprep.mubr.bf16.mxu0 %v1249_v34 }
 0x168   : > { %v452_v36 = vpop.trf.xlu0 }
 0x169   : > { %1015 = vmatmul.mubr.msk.bf16.vlgmr.msra.gmra.mxu1 %vm470_vm1, %v452_v36 }
 0x16a   : > { %537 = vmatprep.mubr.bf16.mxu1 %v1249_v34 }
 0x16c   : > { %v453_v37 = vpop.trf.xlu0 }
 0x170   : > { %v454_v38 = vpop.trf.xlu0 }
 0x171   : > { %1016 = vmatmul.mubr.msk.bf16.gmra.mxu1 %vm470_vm1, %v453_v37 }
 0x172   : > { %547 = vmatprep.mubr.bf16.mxu1 %v1249_v34 }
 0x174   : > { %v455_v39 = vpop.trf.xlu0 }
 0x178   : > { %v456_v40 = vpop.trf.xlu0 }
 0x179   : > { %1017 = vmatmul.mubr.msk.bf16.gmra.mxu1 %vm470_vm1, %v454_v38 }
 0x17a   : > { %557 = vmatprep.mubr.bf16.mxu1 %v1249_v34 }
 0x17c   : > { %v457_v41 = vpop.trf.xlu0 }
 0x180   : > { %v458_v42 = vpop.trf.xlu0 }
 0x181   : > { %1018 = vmatmul.mubr.msk.bf16.gmra.mxu1 %vm470_vm1, %v455_v39 }
 0x182   : > { %567 = vmatprep.mubr.bf16.mxu1 %v1249_v34 }
 0x184   : > { %v459_v43 = vpop.trf.xlu0 }
 0x189   : > { %1019 = vmatmul.mubr.msk.bf16.gmra.mxu1 %vm470_vm1, %v456_v40 }
 0x18a   : > { %577 = vmatprep.mubr.bf16.mxu1 %v1249_v34 }
 0x191   : > { %1020 = vmatmul.mubr.msk.bf16.gmra.mxu1 %vm470_vm1, %v457_v41 }
 0x192   : > { %587 = vmatprep.mubr.bf16.mxu1 %v1249_v34 }
 0x199   : > { %1021 = vmatmul.mubr.msk.bf16.gmra.mxu1 %vm470_vm1, %v458_v42 }
 0x19a   : > { %597 = vmatprep.mubr.bf16.mxu1 %v1249_v34 }
 0x1a1   : > { %1022 = vmatmul.mubr.msk.bf16.gmra.mxu1 %vm470_vm1, %v459_v43 }
 0x229   : > { %v1345_v44 = vpop.f32.mrf.mxu1 }
 0x22b   : > { %v1347_v45 = vpop.f32.mrf.mxu1 }
 0x22c   : > { %v608_v36 = vmax.f32 %v1345_v44, %v1347_v45 }
 0x22d   : > { %v1349_v46 = vpop.f32.mrf.mxu1 }
 0x22f   : > { %v1351_v47 = vpop.f32.mrf.mxu1 }
 0x230   : > { %v611_v19 = vmax.f32 %v1349_v46, %v1351_v47 }
 0x231   : > { %v1353_v48 = vpop.f32.mrf.mxu1 }
 0x233   : > { %v1355_v49 = vpop.f32.mrf.mxu1 }
 0x234   : > { %v614_v35 = vmax.f32 %v1353_v48, %v1355_v49 }
 0x235   : > { %v1357_v50 = vpop.f32.mrf.mxu1 }
 0x237   : > { %v1359_v51 = vpop.f32.mrf.mxu1 }
 0x238   : > { %v617_v16 = vmax.f32 %v1357_v50, %v1359_v51 }
 0x239   : > { %v1361_v52 = vpop.f32.mrf.mxu1 }
 0x23b   : > { %v1363_v53 = vpop.f32.mrf.mxu1 }
 0x23c   : > { %v620_v30 = vmax.f32 %v1361_v52, %v1363_v53 }
 0x23d   : > { %v1365_v54 = vpop.f32.mrf.mxu1 }
 0x23f   : > { %v1367_v55 = vpop.f32.mrf.mxu1 }
 0x240   : > { %v623_v33 = vmax.f32 %v1365_v54, %v1367_v55 }
 0x241   : > { %v1369_v56 = vpop.f32.mrf.mxu1 }
 0x243   : > { %v1371_v57 = vpop.f32.mrf.mxu1 }
 0x244   : > { %v626_v22 = vmax.f32 %v1369_v56, %v1371_v57 }
 0x245   : > { %v1373_v58 = vpop.f32.mrf.mxu1 }
 0x247   : > { %v1375_v59 = vpop.f32.mrf.mxu1 }
 0x248   : > { %v629_v26 = vmax.f32 %v1373_v58, %v1375_v59 }
 0x249   : > { %v1377_v60 = vpop.f32.mrf.mxu1 }
 0x24b   : > { %v1379_v61 = vpop.f32.mrf.mxu1 }
 0x24c   : > { %v632_v18 = vmax.f32 %v1377_v60, %v1379_v61 }
 0x24d   : > { %v1381_v62 = vpop.f32.mrf.mxu1 }
 0x24f   : > { %v1383_v63 = vpop.f32.mrf.mxu1 }
 0x250   : > { %v635_v21 = vmax.f32 %v1381_v62, %v1383_v63 }
 0x251   : > { %v1385_v0 = vpop.f32.mrf.mxu1 }
 0x253   : > { %v1387_v1 = vpop.f32.mrf.mxu1 }
 0x254   : > { %v638_v12 = vmax.f32 %v1385_v0, %v1387_v1 }
 0x255   : > { %v1389_v2 = vpop.f32.mrf.mxu1 }
 0x257   : > { %v1391_v3 = vpop.f32.mrf.mxu1 }
 0x258   : > { %v641_v15 = vmax.f32 %v1389_v2, %v1391_v3 }
 0x259   : > { %v1393_v4 = vpop.f32.mrf.mxu1 }
 0x25b   : > { %v1395_v5 = vpop.f32.mrf.mxu1 }
 0x25c   : > { %v644_v6 = vmax.f32 %v1393_v4, %v1395_v5 }
 0x25d   : > { %v1399_v7 = vpop.f32.mrf.mxu1 }
 0x25e   : > { %645 = vmax.xlane.f32.xlu1 %v644_v6 }
 0x25f   : > { %v1401_v8 = vpop.f32.mrf.mxu1 }
 0x260   : > { %v647_v9 = vmax.f32 %v1399_v7, %v1401_v8 }
 0x261   : > { %v1405_v10 = vpop.f32.mrf.mxu1 }
 0x262   : > { %648 = vmax.xlane.f32.xlu1 %v647_v9 }
 0x263   : > { %v1407_v11 = vpop.f32.mrf.mxu1 }
 0x264   : > { %v650_v13 = vmax.f32 %v1405_v10, %v1407_v11 }
 0x265   : > { %v1413_v14 = vpop.f32.mrf.mxu1 }
 0x266   : > { %639 = vmax.xlane.f32.xlu1 %v638_v12  ;;  %651 = vmax.xlane.f32.xlu0 %v650_v13 }
 0x267   : > { %v1419_v17 = vpop.f32.mrf.mxu1 }
 0x268   : > { %v653_v20 = vmax.f32 %v1413_v14, %v1419_v17 }
 0x26a   : > { %642 = vmax.xlane.f32.xlu1 %v641_v15  ;;  %618 = vmax.xlane.f32.xlu0 %v617_v16 }
 0x26e   : > { %633 = vmax.xlane.f32.xlu1 %v632_v18  ;;  %612 = vmax.xlane.f32.xlu0 %v611_v19 }
 0x272   : > { %654 = vmax.xlane.f32.xlu1 %v653_v20 }
 0x276   : > { %636 = vmax.xlane.f32.xlu1 %v635_v21 }
 0x27a   : > { %627 = vmax.xlane.f32.xlu1 %v626_v22 }
 0x27e   : > { %630 = vmax.xlane.f32.xlu1 %v629_v26 }
 0x282   : > { %621 = vmax.xlane.f32.xlu1 %v620_v30 }
 0x286   : > { %624 = vmax.xlane.f32.xlu1 %v623_v33 }
 0x28a   : > { %615 = vmax.xlane.f32.xlu1 %v614_v35 }
 0x28e   : > { %609 = vmax.xlane.f32.xlu1 %v608_v36 }
 0x2e7   : > { %v646_v37 = vpop.xlane.xlu1 %645 }
 0x2eb   : > { %v649_v38 = vpop.xlane.xlu1 %648 }
 0x2ec   : > { %v682_v40 = vsub.f32 %v1399_v7, %v649_v38  ;;  %v683_v41 = vsub.f32 %v1401_v8, %v649_v38  ;;  %v680_v8 = vsub.f32 %v1393_v4, %v646_v37 }
 0x2ee   : > { %v740_v9 = vmul.f32 1.442695, %v682_v40  ;;  %v742_v16 = vmul.f32 1.442695, %v683_v41  ;;  %v736_v25 = vmul.f32 1.442695, %v680_v8 }
 0x2ef   : > { %v640_v39 = vpop.xlane.xlu1 %639  ;;  %v652_v23 = vpop.xlane.xlu0 %651 }
 0x2f0   : > { %v676_v12 = vsub.f32 %v1385_v0, %v640_v39  ;;  %v677_v18 = vsub.f32 %v1387_v1, %v640_v39  ;;  %v681_v0 = vsub.f32 %v1395_v5, %v646_v37  ;;  %v685_v5 = vsub.f32 %v1407_v11, %v652_v23 }
 0x2f2   : > { %v730_v22 = vmul.f32 1.442695, %v677_v18  ;;  %v738_v27 = vmul.f32 1.442695, %v681_v0  ;;  %v746_v32 = vmul.f32 1.442695, %v685_v5 }
 0x2f3   : > { %v643_v42 = vpop.xlane.xlu1 %642 }
 0x2f4   : > { %v678_v43 = vsub.f32 %v1389_v2, %v643_v42  ;;  %v679_v6 = vsub.f32 %v1391_v3, %v643_v42  ;;  %v728_v2 = vmul.f32 1.442695, %v676_v12  ;;  %v619_v42 = vpop.xlane.xlu0 %618 }
 0x2f6   : > { %v732_v13 = vmul.f32 1.442695, %v678_v43  ;;  %v734_v15 = vmul.f32 1.442695, %v679_v6 }
 0x2f7   : > { %v634_v19 = vpop.xlane.xlu1 %633 }
 0x2f8   : > { %1083 = vpow2.f32 %v732_v13  ;;  %v672_v20 = vsub.f32 %v1377_v60, %v634_v19  ;;  %v673_v7 = vsub.f32 %v1379_v61, %v634_v19  ;;  %v684_v61 = vsub.f32 %v1405_v10, %v652_v23  ;;  %v613_v0 = vpop.xlane.xlu0 %612 }
 0x2f9   : > { %1085 = vpow2.f32 %v734_v15  ;;  %v659_v5 = vsub.f32 %v1351_v47, %v613_v0 }
 0x2fa   : > { %1087 = vpow2.f32 %v740_v9  ;;  %v720_v3 = vmul.f32 1.442695, %v672_v20  ;;  %v722_v21 = vmul.f32 1.442695, %v673_v7  ;;  %v662_v7 = vsub.f32 %v1357_v50, %v619_v42 }
 0x2fb   : > { %1089 = vpow2.f32 %v742_v16  ;;  %v655_v24 = vpop.xlane.xlu1 %654 }
 0x2fc   : > { %1091 = vpow2.f32 %v720_v3  ;;  %v686_v1 = vsub.f32 %v1413_v14, %v655_v24  ;;  %v687_v60 = vsub.f32 %v1419_v17, %v655_v24  ;;  %v744_v14 = vmul.f32 1.442695, %v684_v61 }
 0x2fd   : > { %1093 = vpow2.f32 %v722_v21  ;;  %v663_v21 = vsub.f32 %v1359_v51, %v619_v42 }
 0x2fe   : > { %1095 = vpow2.f32 %v728_v2  ;;  %v748_v4 = vmul.f32 1.442695, %v686_v1  ;;  %v750_v26 = vmul.f32 1.442695, %v687_v60  ;;  %v700_v60 = vmul.f32 1.442695, %v662_v7 }
 0x2ff   : > { %1097 = vpow2.f32 %v730_v22  ;;  %v637_v28 = vpop.xlane.xlu1 %636 }
 0x300   : > { %1099 = vpow2.f32 %v748_v4  ;;  %v674_v29 = vsub.f32 %v1381_v62, %v637_v28  ;;  %v675_v30 = vsub.f32 %v1383_v63, %v637_v28 }
 0x301   : > { %1101 = vpow2.f32 %v750_v26 }
 0x302   : > { %1103 = vpow2.f32 %v736_v25  ;;  %v724_v17 = vmul.f32 1.442695, %v674_v29  ;;  %v726_v31 = vmul.f32 1.442695, %v675_v30  ;;  %v658_v25 = vsub.f32 %v1349_v46, %v613_v0 }
 0x303   : > { %1105 = vpow2.f32 %v738_v27  ;;  %v628_v10 = vpop.xlane.xlu1 %627  ;;  %v702_v27 = vmul.f32 1.442695, %v663_v21 }
 0x304   : > { %1107 = vpow2.f32 %v724_v17  ;;  %v668_v33 = vsub.f32 %v1369_v56, %v628_v10  ;;  %v669_v35 = vsub.f32 %v1371_v57, %v628_v10 }
 0x305   : > { %v1467_v11 = vpop.eup %1083  ;;  %1109 = vpow2.f32 %v726_v31 }
 0x306   : > { %v1469_v36 = vpop.eup %1085  ;;  %1111 = vpow2.f32 %v744_v14  ;;  %v712_v62 = vmul.f32 1.442695, %v668_v33  ;;  %v714_v37 = vmul.f32 1.442695, %v669_v35  ;;  %v692_v14 = vmul.f32 1.442695, %v658_v25 }
 0x307   : > { %v1471_v63 = vpop.eup %1087  ;;  %1113 = vpow2.f32 %v746_v32  ;;  %v631_v38 = vpop.xlane.xlu1 %630  ;;  %v785_v39 = vadd.f32 %v1469_v36, %v1467_v11  ;;  %v694_v32 = vmul.f32 1.442695, %v659_v5  ;;  %v341_v25 = vld [vmem:[%s1639_s2 + $0x18] sm:$0xff] }
 0x308   : > { %v1475_v40 = vpop.eup %1089  ;;  %v670_v56 = vsub.f32 %v1373_v58, %v631_v38  ;;  %v671_v57 = vsub.f32 %v1375_v59, %v631_v38  ;;  %1115 = vpow2.f32 %v712_v62 }
 0x309   : > { %v1479_v41 = vpop.eup %1091  ;;  %786 = vadd.xlane.f32.xlu0 %v785_v39  ;;  %1117 = vpow2.f32 %v714_v37  ;;  %v791_v15 = vadd.f32 %v1475_v40, %v1471_v63 }
 0x30a   : > { %v1481_v43 = vpop.eup %1093  ;;  %v716_v6 = vmul.f32 1.442695, %v670_v56  ;;  %v718_v9 = vmul.f32 1.442695, %v671_v57 }
 0x30b   : > { %v1483_v12 = vpop.eup %1095  ;;  %v622_v13 = vpop.xlane.xlu1 %621  ;;  %v776_v58 = vadd.f32 %v1481_v43, %v1479_v41 }
 0x30c   : > { %v1489_v59 = vpop.eup %1097  ;;  %1119 = vpow2.f32 %v716_v6  ;;  %v664_v16 = vsub.f32 %v1361_v52, %v622_v13  ;;  %v665_v18 = vsub.f32 %v1363_v53, %v622_v13 }
 0x30d   : > { %v1493_v19 = vpop.eup %1099  ;;  %1121 = vpow2.f32 %v718_v9  ;;  %792 = vadd.xlane.f32.xlu0 %v791_v15  ;;  %777 = vadd.xlane.f32.xlu1 %v776_v58  ;;  %v782_v52 = vadd.f32 %v1489_v59, %v1483_v12 }
 0x30e   : > { %v1495_v20 = vpop.eup %1101  ;;  %v704_v8 = vmul.f32 1.442695, %v664_v16  ;;  %v706_v2 = vmul.f32 1.442695, %v665_v18 }
 0x30f   : > { %v1498_v3 = vpop.eup %1103  ;;  %v625_v22 = vpop.xlane.xlu1 %624  ;;  %v797_v53 = vadd.f32 %v1495_v20, %v1493_v19 }
 0x310   : > { %v1505_v23 = vpop.eup %1105  ;;  %1123 = vpow2.f32 %v704_v8  ;;  %v666_v24 = vsub.f32 %v1365_v54, %v625_v22  ;;  %v667_v50 = vsub.f32 %v1367_v55, %v625_v22 }
 0x311   : > { %v1509_v1 = vpop.eup %1107  ;;  %1125 = vpow2.f32 %v706_v2  ;;  %783 = vadd.xlane.f32.xlu1 %v782_v52  ;;  %798 = vadd.xlane.f32.xlu0 %v797_v53  ;;  %v788_v55 = vadd.f32 %v1505_v23, %v1498_v3 }
 0x312   : > { %v1511_v51 = vpop.eup %1109  ;;  %v708_v61 = vmul.f32 1.442695, %v666_v24  ;;  %v710_v4 = vmul.f32 1.442695, %v667_v50  ;;  %v338_v24 = vld [vmem:[%s1639_s2] sm:$0xff]  ;;  %v340_v50 = vld [vmem:[%s1639_s2 + $0x10] sm:$0xff] }
 0x313   : > { %v1514_v26 = vpop.eup %1111  ;;  %v616_v54 = vpop.xlane.xlu1 %615  ;;  %v779_v28 = vadd.f32 %v1511_v51, %v1509_v1 }
 0x314   : > { %v1521_v29 = vpop.eup %1113  ;;  %1127 = vpow2.f32 %v708_v61  ;;  %v660_v30 = vsub.f32 %v1353_v48, %v616_v54  ;;  %v661_v46 = vsub.f32 %v1355_v49, %v616_v54 }
 0x315   : > { %1129 = vpow2.f32 %v710_v4  ;;  %789 = vadd.xlane.f32.xlu1 %v788_v55  ;;  %780 = vadd.xlane.f32.xlu0 %v779_v28  ;;  %v1525_v31 = vpop.eup %1115  ;;  %v794_v33 = vadd.f32 %v1521_v29, %v1514_v26 }
 0x316   : > { %1131 = vpow2.f32 %v700_v60  ;;  %v696_v47 = vmul.f32 1.442695, %v660_v30  ;;  %v698_v17 = vmul.f32 1.442695, %v661_v46  ;;  %v1529_v35 = vpop.eup %1117  ;;  %v339_v60 = vld [vmem:[%s1639_s2 + $0x8] sm:$0xff] }
 0x317   : > { %1133 = vpow2.f32 %v702_v27  ;;  %v610_v10 = vpop.xlane.xlu1 %609  ;;  %v770_v56 = vadd.f32 %v1529_v35, %v1525_v31 }
 0x318   : > { %1135 = vpow2.f32 %v696_v47  ;;  %v656_v48 = vsub.f32 %v1345_v44, %v610_v10  ;;  %v657_v49 = vsub.f32 %v1347_v45, %v610_v10 }
 0x319   : > { %v1533_v62 = vpop.eup %1119  ;;  %1137 = vpow2.f32 %v698_v17  ;;  %795 = vadd.xlane.f32.xlu1 %v794_v33 }
 0x31a   : > { %v1535_v37 = vpop.eup %1121  ;;  %1139 = vpow2.f32 %v692_v14  ;;  %v688_v38 = vmul.f32 1.442695, %v656_v48  ;;  %v690_v39 = vmul.f32 1.442695, %v657_v49 }
 0x31b   : > { %1141 = vpow2.f32 %v694_v32  ;;  %v773_v57 = vadd.f32 %v1535_v37, %v1533_v62 }
 0x31c   : > { %1143 = vpow2.f32 %v688_v38 }
 0x31d   : > { %v1541_v44 = vpop.eup %1123  ;;  %1145 = vpow2.f32 %v690_v39  ;;  %771 = vadd.xlane.f32.xlu1 %v770_v56  ;;  %774 = vadd.xlane.f32.xlu0 %v773_v57 }
 0x31e   : > { %v1543_v45 = vpop.eup %1125 }
 0x31f   : > { %v764_v42 = vadd.f32 %v1543_v45, %v1541_v44 }
 0x321   : > { %v1547_v6 = vpop.eup %1127  ;;  %765 = vadd.xlane.f32.xlu1 %v764_v42 }
 0x322   : > { %v1549_v9 = vpop.eup %1129 }
 0x323   : > { %v1551_v13 = vpop.eup %1131  ;;  %v767_v15 = vadd.f32 %v1549_v9, %v1547_v6 }
 0x324   : > { %v1555_v58 = vpop.eup %1133 }
 0x325   : > { %v1557_v16 = vpop.eup %1135  ;;  %768 = vadd.xlane.f32.xlu0 %v767_v15  ;;  %v761_v8 = vadd.f32 %v1555_v58, %v1551_v13 }
 0x326   : > { %v1559_v18 = vpop.eup %1137 }
 0x327   : > { %v1561_v7 = vpop.eup %1139  ;;  %v758_v2 = vadd.f32 %v1559_v18, %v1557_v16 }
 0x328   : > { %v1567_v21 = vpop.eup %1141 }
 0x329   : > { %v1569_v0 = vpop.eup %1143  ;;  %762 = vadd.xlane.f32.xlu0 %v761_v8  ;;  %759 = vadd.xlane.f32.xlu1 %v758_v2  ;;  %v755_v52 = vadd.f32 %v1567_v21, %v1561_v7 }
 0x32a   : > { %v1571_v22 = vpop.eup %1145 }
 0x32b   : > { %v752_v53 = vadd.f32 %v1571_v22, %v1569_v0 }
 0x32d   : > { %756 = vadd.xlane.f32.xlu0 %v755_v52  ;;  %753 = vadd.xlane.f32.xlu1 %v752_v53 }
 0x33e   : > { %344 = vperm.xlu1 %1075, %v338_v24  }
 0x342   : > { %354 = vperm.xlu1 %1075, %v340_v50  }
 0x343   : > { %349 = vperm.xlu0 %1076, %v339_v60  }
 0x346   : > { %359 = vperm.xlu1 %1075, %v341_v25  }
 0x392   : > { %v787_v61 = vpop.xlane.xlu0 %786 }
 0x396   : > { %v778_v4 = vpop.xlane.xlu1 %777  ;;  %v793_v27 = vpop.xlane.xlu0 %792 }
 0x39a   : > { %v784_v5 = vpop.xlane.xlu1 %783  ;;  %v799_v54 = vpop.xlane.xlu0 %798 }
 0x39b   : > { %1147 = vrcp.f32 %v799_v54 }
 0x39e   : > { %v790_v55 = vpop.xlane.xlu1 %789  ;;  %v781_v30 = vpop.xlane.xlu0 %780 }
 0x39f   : > { %1149 = vrcp.f32 %v790_v55 }
 0x3a0   : > { %1151 = vrcp.f32 %v793_v27 }
 0x3a2   : > { %v796_v28 = vpop.xlane.xlu1 %795 }
 0x3a3   : > { %1153 = vrcp.f32 %v796_v28  ;;  %v1039_v28 = vpop.f32.mrf.mxu0 }
 0x3a4   : > { %1155 = vrcp.f32 %v784_v5 }
 0x3a5   : > { %1157 = vrcp.f32 %v787_v61 }
 0x3a6   : > { %v772_v46 = vpop.xlane.xlu1 %771  ;;  %1159 = vrcp.f32 %v781_v30  ;;  %v775_v14 = vpop.xlane.xlu0 %774 }
 0x3a7   : > { %1161 = vrcp.f32 %v778_v4 }
 0x3a8   : > { %1163 = vrcp.f32 %v775_v14  ;;  %v1148_v47 = vpop.eup %1147 }
 0x3a9   : > { %1165 = vrcp.f32 %v772_v46  ;;  %v847_v49 = vmul.f32 %v1148_v47, %v1495_v20  ;;  %v846_v38 = vmul.f32 %v1148_v47, %v1493_v19 }
 0x3aa   : > { %v766_v32 = vpop.xlane.xlu1 %765 }
 0x3ac   : > { %v1150_v17 = vpop.eup %1149 }
 0x3ad   : > { %v1152_v33 = vpop.eup %1151  ;;  %v841_v57 = vmul.f32 %v1150_v17, %v1505_v23  ;;  %v840_v20 = vmul.f32 %v1150_v17, %v1498_v3 }
 0x3ae   : > { %v769_v10 = vpop.xlane.xlu0 %768  ;;  %v843_v53 = vmul.f32 %v1152_v33, %v1475_v40  ;;  %v842_v60 = vmul.f32 %v1152_v33, %v1471_v63 }
 0x3af   : > { %1167 = vrcp.f32 %v769_v10 }
 0x3b0   : > { %v1154_v48 = vpop.eup %1153  ;;  %1169 = vrcp.f32 %v766_v32  ;;  %v861_v19 = vpack.c.bf16 %v843_v53, %v841_v57  ;;  %v860_v40 = vpack.c.bf16 %v842_v60, %v840_v20 }
 0x3b1   : > { %v845_v39 = vmul.f32 %v1154_v48, %v1521_v29  ;;  %v844_v56 = vmul.f32 %v1154_v48, %v1514_v26  ;;  %v1156_v42 = vpop.eup %1155 }
 0x3b2   : > { %v763_v15 = vpop.xlane.xlu0 %762  ;;  %v760_v8 = vpop.xlane.xlu1 %759  ;;  %v837_v29 = vmul.f32 %v1156_v42, %v1489_v59  ;;  %v836_v4 = vmul.f32 %v1156_v42, %v1483_v12 }
 0x3b3   : > { %v863_v2 = vpack.c.bf16 %v847_v49, %v845_v39  ;;  %v862_v52 = vpack.c.bf16 %v846_v38, %v844_v56  ;;  %v1158_v24 = vpop.eup %1157  ;;  %1171 = vrcp.f32 %v763_v15 }
 0x3b4   : > { %1173 = vrcp.f32 %v760_v8  ;;  %v1160_v26 = vpop.eup %1159  ;;  %v839_v25 = vmul.f32 %v1158_v24, %v1469_v36  ;;  %v838_v54 = vmul.f32 %v1158_v24, %v1467_v11  ;;  %v413_v11 = vpop.f32.mrf.mxu0 }
 0x3b5   : > { %874 = vmatprep.subr.bf16.mxu0 %v863_v2  ;;  %v1162_v61 = vpop.eup %1161  ;;  %v835_v5 = vmul.f32 %v1160_v26, %v1511_v51  ;;  %v834_v36 = vmul.f32 %v1160_v26, %v1509_v1 }
 0x3b6   : > { %v757_v50 = vpop.xlane.xlu0 %756  ;;  %v754_v23 = vpop.xlane.xlu1 %753  ;;  %875 = vmatpush1.bf16.msra.mxu0 %v862_v52  ;;  %v859_v27 = vpack.c.bf16 %v839_v25, %v837_v29  ;;  %v833_v63 = vmul.f32 %v1162_v61, %v1481_v43  ;;  %v858_v55 = vpack.c.bf16 %v838_v54, %v836_v4  ;;  %v832_v51 = vmul.f32 %v1162_v61, %v1479_v41  ;;  %v867_v54 = vld [vmem:[#allocation6 + $0x18] sm:$0xff] }
 0x3b7   : > { %876 = vmatprep.subr.bf16.mxu0 %v861_v19  ;;  %1175 = vrcp.f32 %v757_v50  ;;  %v1164_v3 = vpop.eup %1163  ;;  %v1040_v49 = vpop.f32.mrf.mxu0 }
 0x3b8   : > { %1177 = vrcp.f32 %v754_v23  ;;  %v1166_v59 = vpop.eup %1165  ;;  %v857_v30 = vpack.c.bf16 %v835_v5, %v833_v63  ;;  %v831_v12 = vmul.f32 %v1164_v3, %v1535_v37  ;;  %v856_v17 = vpack.c.bf16 %v834_v36, %v832_v51 }
 0x3b9   : > { %v829_v46 = vmul.f32 %v1166_v59, %v1529_v35  ;;  %v828_v32 = vmul.f32 %v1166_v59, %v1525_v31  ;;  %v830_v43 = vmul.f32 %v1164_v3, %v1533_v62  ;;  %v416_v15 = vpop.f32.mrf.mxu0 }
 0x3ba   : > { %877 = vmatpush1.bf16.msra.mxu0 %v860_v40  ;;  %v345_v37 = vpop.permute.xlu1 %344  ;;  %v865_v40 = vld [vmem:[#allocation6 + $0x8] sm:$0xff] }
 0x3bb   : > { %878 = vmatprep.subr.bf16.mxu0 %v859_v27  ;;  %v855_v33 = vpack.c.bf16 %v831_v12, %v829_v46  ;;  %v854_v41 = vpack.c.bf16 %v830_v43, %v828_v32  ;;  %v866_v27 = vld [vmem:[#allocation6 + $0x10] sm:$0xff] }
 0x3bc   : > { %v1168_v14 = vpop.eup %1167 }
 0x3bd   : > { %v1170_v47 = vpop.eup %1169  ;;  %v827_v1 = vmul.f32 %v1168_v14, %v1549_v9  ;;  %v826_v38 = vmul.f32 %v1168_v14, %v1547_v6  ;;  %v870_v14 = vld [vmem:[#allocation6 + $0x30] sm:$0xff] }
 0x3be   : > { %879 = vmatpush1.bf16.msra.mxu0 %v858_v55  ;;  %v825_v35 = vmul.f32 %v1170_v47, %v1543_v45  ;;  %v824_v9 = vmul.f32 %v1170_v47, %v1541_v44  ;;  %v350_v42 = vpop.permute.xlu0 %349 }
 0x3bf   : > { %880 = vmatprep.subr.bf16.mxu0 %v857_v30  ;;  %v417_v24 = vadd.f32 %v416_v15, %v350_v42  ;;  %v869_v30 = vld [vmem:[#allocation6 + $0x28] sm:$0xff] }
 0x3c0   : > { %v1172_v10 = vpop.eup %1171  ;;  %v853_v56 = vpack.c.bf16 %v827_v1, %v825_v35  ;;  %v852_v8 = vpack.c.bf16 %v826_v38, %v824_v9 }
 0x3c1   : > { %v1174_v48 = vpop.eup %1173  ;;  %v823_v62 = vmul.f32 %v1172_v10, %v1555_v58  ;;  %v822_v2 = vmul.f32 %v1172_v10, %v1551_v13  ;;  %v414_v58 = vadd.f32 %v413_v11, %v345_v37  ;;  %v429_v26 = vmax.f32 %v417_v24, 0.0 }
 0x3c2   : > { %881 = vmatpush1.bf16.msra.mxu0 %v856_v17  ;;  %v821_v31 = vmul.f32 %v1174_v48, %v1559_v18  ;;  %v820_v45 = vmul.f32 %v1174_v48, %v1557_v16  ;;  %v355_v18 = vpop.permute.xlu1 %354  ;;  %v871_v17 = vld [vmem:[#allocation6 + $0x38] sm:$0xff] }
 0x3c3   : > { %882 = vmatprep.subr.bf16.mxu0 %v855_v33  ;;  %v428_v16 = vmax.f32 %v414_v58, 0.0 }
 0x3c4   : > { %v1176_v39 = vpop.eup %1175  ;;  %v851_v52 = vpack.c.bf16 %v823_v62, %v821_v31  ;;  %v850_v20 = vpack.c.bf16 %v822_v2, %v820_v45 }
 0x3c5   : > { %v1178_v57 = vpop.eup %1177  ;;  %v819_v53 = vmul.f32 %v1176_v39, %v1567_v21  ;;  %v818_v19 = vmul.f32 %v1176_v39, %v1561_v7  ;;  %v872_v23 = vpack.c.bf16 %v429_v26, %v428_v16 }
 0x3c6   : > { %883 = vmatpush1.bf16.msra.mxu0 %v854_v41  ;;  %v817_v6 = vmul.f32 %v1178_v57, %v1571_v22  ;;  %v816_v44 = vmul.f32 %v1178_v57, %v1569_v0  ;;  %v360_v13 = vpop.permute.xlu1 %359  ;;  %v422_v22 = vadd.f32 %v1039_v28, %v355_v18  ;;  %v864_v0 = vld [vmem:[#allocation6] sm:$0xff] }
 0x3c7   : > { %884 = vmatprep.subr.bf16.mxu0 %v853_v56  ;;  %v425_v21 = vadd.f32 %v1040_v49, %v360_v13  ;;  %v868_v28 = vld [vmem:[#allocation6 + $0x20] sm:$0xff] }
 0x3c8   : > { %v849_v29 = vpack.c.bf16 %v819_v53, %v817_v6  ;;  %v848_v50 = vpack.c.bf16 %v818_v19, %v816_v44  ;;  %v430_v60 = vmax.f32 %v422_v22, 0.0 }
 0x3c9   : > { %v431_v25 = vmax.f32 %v425_v21, 0.0 }
 0x3ca   : > { %885 = vmatpush1.bf16.msra.mxu0 %v852_v8 }
 0x3cb   : > { %886 = vmatprep.subr.bf16.mxu0 %v851_v52  ;;  %v873_v61 = vpack.c.bf16 %v431_v25, %v430_v60 }
 0x3ce   : > { %887 = vmatpush1.bf16.msra.mxu0 %v850_v20 }
 0x3cf   : > { %888 = vmatprep.subr.bf16.mxu0 %v849_v29 }
 0x3d2   : > { %889 = vmatpush1.bf16.msra.mxu0 %v848_v50 }
 0x3d5   : > { %907 = vmatmul.mubr.bf16.vlgmr.msra.gmra.mxu0 %v872_v23 }
 0x3d6   : > { %916 = vmatprep.mubr.bf16.mxu0 %v1249_v34 }
 0x3dd   : > { %917 = vmatmul.mubr.bf16.gmra.mxu0 %v873_v61 }
 0x495   : > { %v908_v7 = vpop.f32.mrf.mxu0 }
 0x496   : > { %v927_v4 = vadd.f32 %v908_v7, %v864_v0 }
 0x497   : > { %v910_v3 = vpop.f32.mrf.mxu0 }
 0x498   : > { %935 = vst [vmem:[#allocation6] sm:$0xff] %v927_v4  ;;  %v928_v5 = vadd.f32 %v910_v3, %v865_v40 }
 0x499   : > { %v912_v59 = vpop.f32.mrf.mxu0 }
 0x49a   : > { %936 = vst [vmem:[#allocation6 + $0x8] sm:$0xff] %v928_v5  ;;  %v929_v63 = vadd.f32 %v912_v59, %v866_v27 }
 0x49b   : > { %v914_v55 = vpop.f32.mrf.mxu0 }
 0x49c   : > { %937 = vst [vmem:[#allocation6 + $0x10] sm:$0xff] %v929_v63  ;;  %v930_v34 = vadd.f32 %v914_v55, %v867_v54 }
 0x49d   : > { %v918_v36 = vpop.f32.mrf.mxu0 }
 0x49e   : > { %938 = vst [vmem:[#allocation6 + $0x18] sm:$0xff] %v930_v34  ;;  %v931_v46 = vadd.f32 %v918_v36, %v868_v28 }
 0x49f   : > { %v920_v12 = vpop.f32.mrf.mxu0 }
 0x4a0   : > { %939 = vst [vmem:[#allocation6 + $0x20] sm:$0xff] %v931_v46  ;;  %v932_v51 = vadd.f32 %v920_v12, %v869_v30 }
 0x4a1   : > { %v922_v47 = vpop.f32.mrf.mxu0 }
 0x4a2   : > { %940 = vst [vmem:[#allocation6 + $0x28] sm:$0xff] %v932_v51  ;;  %v933_v11 = vadd.f32 %v922_v47, %v870_v14 }
 0x4a3   : > { %v924_v32 = vpop.f32.mrf.mxu0 }
 0x4a4   : > { %941 = vst [vmem:[#allocation6 + $0x30] sm:$0xff] %v933_v11  ;;  %v934_v43 = vadd.f32 %v924_v32, %v871_v17 }
 0x4a6   : > { %942 = vst [vmem:[#allocation6 + $0x38] sm:$0xff] %v934_v43 }
 0x4a7   : > { %1218 = shalt.err (!%p1215_p8)
}
 0x4a8   : > { %s1251_s7 = smov 256   ;;  %s1252_s8 = smov 16  }
 0x4a9   : > { %1046 = dma.vmem_to_hbm [thread:$0]  (%p1055_p1), %s950_s30, 1024, %s1642_s5, [#allocation5], %s1251_s7, %s1251_s7, %s1252_s8  }
 0x4aa   : > { %1238 = dma.done.wait (%p1055_p1), [#allocation5], 1024  }
 0x4ab   : > { %1240 = vsyncadd (%p1055_p1), [#allocation5], 4294966272 }
 0x4ac PF: > { %s17_s18 = sadd.s32 1, %s1243_s18  }
 0x4ad   : > { %p14_p9 = scmp.ge.s32.totalorder %s17_s18, 4  }
 0x4af   :  { %16 = sbr.rel (!%p14_p9) target bundleno = 2 (0x2), region = 75 }
 0x4b4   :  { %965 = vsyncpa [#allocation4], 1 }
 0x4b5   :  { %967 = vsyncpa [#allocation4 + $0x1], 1 }
 0x4b6   :  { %968 = vsyncpa [#allocation5], 1 }
 0x4b7   :  { %970 = vsyncpa [#allocation5 + $0x1], 1 }

</bundles_post_ra>
